<compile_context>
chip_gen: v7x
topology: tpu7x:2x2x1
jax: 0.10.0
libtpu: 0.0.40
codegen_flags: <defaults>
</compile_context>

<pallas_src>
from functools import partial

import jax
import jax.numpy as jnp
from jax.experimental import pallas as pl
from jax.experimental.pallas import tpu as pltpu

EPS = 1e-5  # torch.nn.LayerNorm default eps

# ---- packed (17, C) bias / LayerNorm vector indices ----
_CONV_B = 0
_SIM_LN1_G, _SIM_LN1_B = 1, 2
_SIM_MLP_B1, _SIM_MLP_B2 = 3, 4
_SIM_LN2_G, _SIM_LN2_B = 5, 6
_ATTN_BQ, _ATTN_BK, _ATTN_BV, _ATTN_BO = 7, 8, 9, 10
_LIM_LN1_G, _LIM_LN1_B = 11, 12
_LIM_MLP_B1, _LIM_MLP_B2 = 13, 14
_LIM_LN2_G, _LIM_LN2_B = 15, 16
_NVEC = 17

# ---- packed (5, C, C) matrices, all stored as (C_in, C_out) so x @ W ----
_SIM_W1, _SIM_W2 = 0, 1
_WO = 2
_LIM_W1, _LIM_W2 = 3, 4
_NMAT = 5


def _ln(x, g, b):
    mu = jnp.mean(x, axis=-1, keepdims=True)
    xc = x - mu
    var = jnp.mean(xc * xc, axis=-1, keepdims=True)
    return xc * jax.lax.rsqrt(var + EPS) * g + b


def _bdot(a, w):
    """MXU matmul with bf16 operands, f32 accumulation."""
    return jnp.dot(a.astype(jnp.bfloat16), w.astype(jnp.bfloat16),
                   preferred_element_type=jnp.float32)


def _lscm_kernel(patch_ref, x_ref, wc_ref, wqkv_ref, wm_ref, vec_ref, out_ref,
                 *, S, T, C, H):
    Dh = C // H
    patches = patch_ref[0]                           # (S*T, ks*kk*C) bf16
    xres = x_ref[0].astype(jnp.float32)              # (S*T, C)

    # -------- SIM: conv (single im2col matmul) -> LN1 -> MLP -> +x -> LN2 ----
    conv = jnp.dot(patches, wc_ref[...],
                   preferred_element_type=jnp.float32) + vec_ref[_CONV_B]
    u_ls = _ln(conv, vec_ref[_SIM_LN1_G], vec_ref[_SIM_LN1_B])
    h = jnp.maximum(_bdot(u_ls, wm_ref[_SIM_W1]) + vec_ref[_SIM_MLP_B1], 0.0)
    m = _bdot(h, wm_ref[_SIM_W2]) + vec_ref[_SIM_MLP_B2]
    u_sl = _ln(m + xres, vec_ref[_SIM_LN2_G], vec_ref[_SIM_LN2_B])

    # -------- LIM: multi-head self-attention over T, batched over S ---------
    # Fused QKV projection: one (C, 3C) MXU push instead of three (C, C).
    qkv = _bdot(u_sl, wqkv_ref[...])                 # (S*T, 3C) f32
    q = qkv[:, 0 * C:1 * C] + vec_ref[_ATTN_BQ]
    k = qkv[:, 1 * C:2 * C] + vec_ref[_ATTN_BK]
    v = qkv[:, 2 * C:3 * C] + vec_ref[_ATTN_BV]
    wo = wm_ref[_WO]                                 # (C, C) bf16
    scale = 1.0 / (Dh ** 0.5)

    attn = jnp.zeros((S * T, C), jnp.float32)
    for hh in range(H):
        lo, hi = hh * Dh, (hh + 1) * Dh
        qh = q[:, lo:hi].reshape(S, T, Dh).astype(jnp.bfloat16)
        kh = k[:, lo:hi].reshape(S, T, Dh).astype(jnp.bfloat16)
        vh = v[:, lo:hi].reshape(S, T, Dh).astype(jnp.bfloat16)
        sc = jax.lax.dot_general(                     # (S, T, T) scores
            qh, kh, (((2,), (2,)), ((0,), (0,))),
            preferred_element_type=jnp.float32) * scale
        sc = sc - jnp.max(sc, axis=-1, keepdims=True)
        p = jnp.exp(sc)
        p = p * pl.reciprocal(jnp.sum(p, axis=-1, keepdims=True), approx=True)
        oh = jax.lax.dot_general(                     # (S, T, Dh)
            p.astype(jnp.bfloat16), vh, (((2,), (1,)), ((0,), (0,))),
            preferred_element_type=jnp.float32)
        # fold the head straight into the output projection: no lane concat.
        attn = attn + jnp.dot(oh.reshape(S * T, Dh).astype(jnp.bfloat16),
                              wo[lo:hi, :], preferred_element_type=jnp.float32)
    attn = attn + vec_ref[_ATTN_BO]

    # -------- LIM: LN1 -> MLP -> +residual -> LN2 ----------------------------
    h_l = _ln(attn + u_sl, vec_ref[_LIM_LN1_G], vec_ref[_LIM_LN1_B])
    g = jnp.maximum(_bdot(h_l, wm_ref[_LIM_W1]) + vec_ref[_LIM_MLP_B1], 0.0)
    mlp = _bdot(g, wm_ref[_LIM_W2]) + vec_ref[_LIM_MLP_B2]
    out_ref[0] = _ln(mlp + h_l, vec_ref[_LIM_LN2_G],
                     vec_ref[_LIM_LN2_B]).astype(out_ref.dtype)


def lscm_block_forward(x, p, ks, kk, H):
    """x: (B, S, T, C) channels-last.  Returns (B, S, T, C) float32."""
    B, S, T, C = x.shape
    assert C % H == 0 and ks % 2 == 1 and kk % 2 == 1
    ph, pw = (ks - 1) // 2, (kk - 1) // 2
    KC = ks * kk * C

    # im2col in the wrapper: the kernel then issues one K=ks*kk*C matmul
    # instead of ks*kk shifted-slice dots (and their VMEM relayouts).
    xpad = jnp.pad(x, ((0, 0), (ph, ph), (pw, pw), (0, 0)))
    taps = [xpad[:, dy:dy + S, dx:dx + T, :]
            for dy in range(ks) for dx in range(kk)]
    patches = jnp.concatenate(taps, axis=-1).reshape(B, S * T, KC)
    patches = patches.astype(jnp.bfloat16)
    xr = x.reshape(B, S * T, C)

    out = pl.pallas_call(
        partial(_lscm_kernel, S=S, T=T, C=C, H=H),
        out_shape=jax.ShapeDtypeStruct((B, S * T, C), jnp.float32),
        grid=(B,),
        in_specs=[
            pl.BlockSpec((1, S * T, KC), lambda b: (b, 0, 0)),
            pl.BlockSpec((1, S * T, C), lambda b: (b, 0, 0)),
            pl.BlockSpec((KC, C), lambda b: (0, 0)),
            pl.BlockSpec((C, 3 * C), lambda b: (0, 0)),
            pl.BlockSpec((_NMAT, C, C), lambda b: (0, 0, 0)),
            pl.BlockSpec((_NVEC, C), lambda b: (0, 0)),
        ],
        out_specs=pl.BlockSpec((1, S * T, C), lambda b: (b, 0, 0)),
        compiler_params=pltpu.CompilerParams(
            dimension_semantics=("parallel",)),
    )(patches, xr, p['wc_bf16'], p['wqkv_bf16'], p['wmat_bf16'], p['vec_f32'])
    return out.reshape(B, S, T, C)


# ----------------------------------------------------------------------------
# Deterministic parameter construction (PyTorch shapes, repacked for kernel)
# ----------------------------------------------------------------------------
def init_params(key, C, ks, kk):
    keys = jax.random.split(key, 24)
    it = iter(keys)

    def nrm(shape, scale=0.08):
        return jax.random.normal(next(it), shape, jnp.float32) * scale

    # SIM.conv : nn.Conv2d(C, C, (ks, kk)) -> PyTorch weight (C_out, C_in, ks, kk)
    conv_w = nrm((C, C, ks, kk))
    conv_b = nrm((C,))

    def ln_gb():  # (2, C): [gamma, beta]
        return jnp.stack([1.0 + nrm((C,)), nrm((C,))])

    sim_gb = jnp.concatenate([ln_gb(), ln_gb()], axis=0)          # (4, C)
    sim_W1, sim_b1 = nrm((C, C)), nrm((C,))
    sim_W2, sim_b2 = nrm((C, C)), nrm((C,))
    sim_w = jnp.stack([sim_W1.T, sim_W2.T])                       # (2, C, C)
    sim_b = jnp.stack([sim_b1, sim_b2])                           # (2, C)

    # LIM.self_attention : nn.MultiheadAttention(C, H)
    in_proj_w, in_proj_b = nrm((3 * C, C)), nrm((3 * C,))
    out_proj_w, out_proj_b = nrm((C, C)), nrm((C,))
    attn_w = jnp.stack([in_proj_w[0:C].T, in_proj_w[C:2 * C].T,
                        in_proj_w[2 * C:3 * C].T, out_proj_w.T])  # (4, C, C)
    attn_b = jnp.stack([in_proj_b[0:C], in_proj_b[C:2 * C],
                        in_proj_b[2 * C:3 * C], out_proj_b])      # (4, C)

    lim_gb = jnp.concatenate([ln_gb(), ln_gb()], axis=0)
    lim_W1, lim_b1 = nrm((C, C)), nrm((C,))
    lim_W2, lim_b2 = nrm((C, C)), nrm((C,))
    lim_w = jnp.stack([lim_W1.T, lim_W2.T])
    lim_b = jnp.stack([lim_b1, lim_b2])

    # ---- packed arrays for the fused kernel ----
    # conv weight repacked so rows follow the im2col tap order (dy, dx, c_in).
    wc = jnp.transpose(conv_w, (2, 3, 1, 0)).reshape(ks * kk * C, C)
    # fused QKV projection weight: (C, 3C) = [Wq | Wk | Wv]
    wqkv = jnp.concatenate([attn_w[0], attn_w[1], attn_w[2]], axis=1)
    wmat = jnp.stack([sim_w[0], sim_w[1],
                      attn_w[3],
                      lim_w[0], lim_w[1]])                        # (5, C, C)
    vec = jnp.stack([conv_b,
                     sim_gb[0], sim_gb[1], sim_b[0], sim_b[1],
                     sim_gb[2], sim_gb[3],
                     attn_b[0], attn_b[1], attn_b[2], attn_b[3],
                     lim_gb[0], lim_gb[1], lim_b[0], lim_b[1],
                     lim_gb[2], lim_gb[3]])                       # (17, C)

    return dict(conv_w=conv_w, conv_b=conv_b,
                sim_gb=sim_gb, sim_w=sim_w, sim_b=sim_b,
                attn_w=attn_w, attn_b=attn_b,
                lim_gb=lim_gb, lim_w=lim_w, lim_b=lim_b,
                wc_bf16=wc.astype(jnp.bfloat16),
                wqkv_bf16=wqkv.astype(jnp.bfloat16),
                wmat_bf16=wmat.astype(jnp.bfloat16),
                vec_f32=vec)


# ----------------------------------------------------------------------------
# Pure-JAX reference (same math, XLA ops) for a correctness check
# ----------------------------------------------------------------------------
def reference(x, p, ks, kk, H):
    B, S, T, C = x.shape
    ph, pw = (ks - 1) // 2, (kk - 1) // 2

    def ln(z, g, b):
        mu = z.mean(-1, keepdims=True)
        var = ((z - mu) ** 2).mean(-1, keepdims=True)
        return (z - mu) / jnp.sqrt(var + EPS) * g + b

    xin = jnp.transpose(x, (0, 3, 1, 2))                  # NCHW
    conv = jax.lax.conv_general_dilated(
        xin, p['conv_w'], window_strides=(1, 1),
        padding=((ph, ph), (pw, pw)),
        dimension_numbers=('NCHW', 'OIHW', 'NCHW'),
        precision=jax.lax.Precision.HIGHEST)
    conv = conv + p['conv_b'][None, :, None, None]
    conv = jnp.transpose(conv, (0, 2, 3, 1))              # (B, S, T, C)

    u_ls = ln(conv, p['sim_gb'][0], p['sim_gb'][1])
    m = jnp.maximum(u_ls @ p['sim_w'][0] + p['sim_b'][0], 0.0) @ p['sim_w'][1] + p['sim_b'][1]
    u_sl = ln(m + x, p['sim_gb'][2], p['sim_gb'][3])

    q = u_sl @ p['attn_w'][0] + p['attn_b'][0]
    k = u_sl @ p['attn_w'][1] + p['attn_b'][1]
    v = u_sl @ p['attn_w'][2] + p['attn_b'][2]
    Dh = C // H
    split = lambda z: z.reshape(B, S, T, H, Dh)
    qh, kh, vh = split(q), split(k), split(v)
    sc = jnp.einsum('bsthd,bsuhd->bshtu', qh, kh) / (Dh ** 0.5)
    attw = jax.nn.softmax(sc, axis=-1)
    attn = jnp.einsum('bshtu,bsuhd->bsthd', attw, vh).reshape(B, S, T, C)
    attn = attn @ p['attn_w'][3] + p['attn_b'][3]

    h_l = ln(attn + u_sl, p['lim_gb'][0], p['lim_gb'][1])
    mlp = jnp.maximum(h_l @ p['lim_w'][0] + p['lim_b'][0], 0.0) @ p['lim_w'][1] + p['lim_b'][1]
    return ln(mlp + h_l, p['lim_gb'][2], p['lim_gb'][3])


if __name__ == "__main__":
    B, S, T, C, H = 2, 4, 8, 32, 4      # batch, speakers, time, d_model, heads
    ks, kk = 3, 3                        # SIM conv kernel (s, k)

    key = jax.random.PRNGKey(0)
    kx, kp = jax.random.split(key)
    x = jax.random.normal(kx, (B, S, T, C), jnp.float32)
    params = init_params(kp, C, ks, kk)

    out = jax.block_until_ready(lscm_block_forward(x, params, ks, kk, H))

    with jax.default_matmul_precision("highest"):
        ref = jax.block_until_ready(reference(x, params, ks, kk, H))

    assert out.shape == (B, S, T, C)
    err = float(jnp.max(jnp.abs(out - ref)))
    # Loose tolerance accounts for bf16 MXU operands vs. the f32 "highest" reference.
    assert jnp.allclose(out, ref, atol=1e-1, rtol=1e-1), err

    print("KERNEL_OK")
</pallas_src>

<mosaic_0001>
module attributes {stable_mosaic.version = 11 : i64} {
  func.func @_lscm_kernel(%arg0: i32, %arg1: memref<1x32x288xbf16, #tpu.memory_space<vmem>>, %arg2: memref<1x32x32xf32, #tpu.memory_space<vmem>>, %arg3: memref<288x32xbf16, #tpu.memory_space<vmem>>, %arg4: memref<32x96xbf16, #tpu.memory_space<vmem>>, %arg5: memref<5x32x32xbf16, #tpu.memory_space<vmem>>, %arg6: memref<17x32xf32, #tpu.memory_space<vmem>>, %arg7: memref<1x32x32xf32, #tpu.memory_space<vmem>>) attributes {dimension_semantics = [#tpu.dimension_semantics<parallel>], iteration_bounds = array<i64: 2>, scalar_prefetch = 0 : i64, scratch_operands = 0 : i64, tpu.core_type = #tpu.core_type<tc>, window_params = [{transform_indices = @transform_0, window_bounds = array<i64: 1, 32, 288>}, {transform_indices = @transform_1, window_bounds = array<i64: 1, 32, 32>}, {pipeline_mode = #tpu.pipeline_mode<synchronous>, transform_indices = @transform_2, window_bounds = array<i64: 288, 32>}, {pipeline_mode = #tpu.pipeline_mode<synchronous>, transform_indices = @transform_3, window_bounds = array<i64: 32, 96>}, {pipeline_mode = #tpu.pipeline_mode<synchronous>, transform_indices = @transform_4, window_bounds = array<i64: 5, 32, 32>}, {pipeline_mode = #tpu.pipeline_mode<synchronous>, transform_indices = @transform_5, window_bounds = array<i64: 17, 32>}, {transform_indices = @transform_6, window_bounds = array<i64: 1, 32, 32>}]} {
    %c0 = arith.constant 0 : index
    %c0_0 = arith.constant 0 : index
    %c0_1 = arith.constant 0 : index
    %0 = vector.load %arg1[%c0, %c0_0, %c0_1] : memref<1x32x288xbf16, #tpu.memory_space<vmem>>, vector<1x32x288xbf16>
    %1 = vector.shape_cast %0 : vector<1x32x288xbf16> to vector<32x288xbf16>
    %c0_2 = arith.constant 0 : index
    %c0_3 = arith.constant 0 : index
    %c0_4 = arith.constant 0 : index
    %2 = vector.load %arg2[%c0_2, %c0_3, %c0_4] : memref<1x32x32xf32, #tpu.memory_space<vmem>>, vector<1x32x32xf32>
    %3 = vector.shape_cast %2 : vector<1x32x32xf32> to vector<32x32xf32>
    %c0_5 = arith.constant 0 : index
    %c0_6 = arith.constant 0 : index
    %4 = vector.load %arg3[%c0_5, %c0_6] : memref<288x32xbf16, #tpu.memory_space<vmem>>, vector<288x32xbf16>
    %cst = arith.constant dense<0.000000e+00> : vector<32x32xf32>
    %5 = tpu.matmul %1, %4, %cst {dimension_numbers = #tpu.dot_dimension_numbers<[1], [0], [0], [1], [0, 0, 1, 1], [], []>} : vector<32x288xbf16>, vector<288x32xbf16>, vector<32x32xf32> -> vector<32x32xf32>
    %c0_7 = arith.constant 0 : index
    %c0_8 = arith.constant 0 : index
    %6 = vector.load %arg6[%c0_7, %c0_8] : memref<17x32xf32, #tpu.memory_space<vmem>>, vector<1x32xf32>
    %7 = vector.shape_cast %6 : vector<1x32xf32> to vector<32xf32>
    %8 = vector.shape_cast %7 : vector<32xf32> to vector<1x32xf32>
    %9 = vector.broadcast %8 : vector<1x32xf32> to vector<32x32xf32>
    %10 = arith.addf %5, %9 : vector<32x32xf32>
    %c1 = arith.constant 1 : index
    %c0_9 = arith.constant 0 : index
    %11 = vector.load %arg6[%c1, %c0_9] : memref<17x32xf32, #tpu.memory_space<vmem>>, vector<1x32xf32>
    %12 = vector.shape_cast %11 : vector<1x32xf32> to vector<32xf32>
    %c2 = arith.constant 2 : index
    %c0_10 = arith.constant 0 : index
    %13 = vector.load %arg6[%c2, %c0_10] : memref<17x32xf32, #tpu.memory_space<vmem>>, vector<1x32xf32>
    %14 = vector.shape_cast %13 : vector<1x32xf32> to vector<32xf32>
    %cst_11 = arith.constant dense<0.000000e+00> : vector<32xf32>
    %15 = vector.multi_reduction <add>, %10, %cst_11 [1] : vector<32x32xf32> to vector<32xf32>
    %16 = vector.shape_cast %15 : vector<32xf32> to vector<32x1xf32>
    %cst_12 = arith.constant 3.200000e+01 : f32
    %17 = vector.broadcast %cst_12 : f32 to vector<32x1xf32>
    %18 = arith.divf %16, %17 : vector<32x1xf32>
    %19 = vector.broadcast %18 : vector<32x1xf32> to vector<32x32xf32>
    %20 = arith.subf %10, %19 : vector<32x32xf32>
    %21 = arith.mulf %20, %20 : vector<32x32xf32>
    %cst_13 = arith.constant dense<0.000000e+00> : vector<32xf32>
    %22 = vector.multi_reduction <add>, %21, %cst_13 [1] : vector<32x32xf32> to vector<32xf32>
    %23 = vector.shape_cast %22 : vector<32xf32> to vector<32x1xf32>
    %cst_14 = arith.constant 3.200000e+01 : f32
    %24 = vector.broadcast %cst_14 : f32 to vector<32x1xf32>
    %25 = arith.divf %23, %24 : vector<32x1xf32>
    %cst_15 = arith.constant 9.99999974E-6 : f32
    %26 = vector.broadcast %cst_15 : f32 to vector<32x1xf32>
    %27 = arith.addf %25, %26 : vector<32x1xf32>
    %28 = math.rsqrt %27 : vector<32x1xf32>
    %29 = vector.broadcast %28 : vector<32x1xf32> to vector<32x32xf32>
    %30 = arith.mulf %20, %29 : vector<32x32xf32>
    %31 = vector.shape_cast %12 : vector<32xf32> to vector<1x32xf32>
    %32 = vector.broadcast %31 : vector<1x32xf32> to vector<32x32xf32>
    %33 = arith.mulf %30, %32 : vector<32x32xf32>
    %34 = vector.shape_cast %14 : vector<32xf32> to vector<1x32xf32>
    %35 = vector.broadcast %34 : vector<1x32xf32> to vector<32x32xf32>
    %36 = arith.addf %33, %35 : vector<32x32xf32>
    %c0_16 = arith.constant 0 : index
    %c0_17 = arith.constant 0 : index
    %c0_18 = arith.constant 0 : index
    %37 = vector.load %arg5[%c0_16, %c0_17, %c0_18] : memref<5x32x32xbf16, #tpu.memory_space<vmem>>, vector<1x32x32xbf16>
    %38 = vector.shape_cast %37 : vector<1x32x32xbf16> to vector<32x32xbf16>
    %39 = arith.truncf %36 : vector<32x32xf32> to vector<32x32xbf16>
    %cst_19 = arith.constant dense<0.000000e+00> : vector<32x32xf32>
    %40 = tpu.matmul %39, %38, %cst_19 {dimension_numbers = #tpu.dot_dimension_numbers<[1], [0], [0], [1], [0, 0, 1, 1], [], []>} : vector<32x32xbf16>, vector<32x32xbf16>, vector<32x32xf32> -> vector<32x32xf32>
    %c3 = arith.constant 3 : index
    %c0_20 = arith.constant 0 : index
    %41 = vector.load %arg6[%c3, %c0_20] : memref<17x32xf32, #tpu.memory_space<vmem>>, vector<1x32xf32>
    %42 = vector.shape_cast %41 : vector<1x32xf32> to vector<32xf32>
    %43 = vector.shape_cast %42 : vector<32xf32> to vector<1x32xf32>
    %44 = vector.broadcast %43 : vector<1x32xf32> to vector<32x32xf32>
    %45 = arith.addf %40, %44 : vector<32x32xf32>
    %cst_21 = arith.constant 0.000000e+00 : f32
    %46 = vector.broadcast %cst_21 : f32 to vector<32x32xf32>
    %47 = arith.maximumf %45, %46 : vector<32x32xf32>
    %c1_22 = arith.constant 1 : index
    %c0_23 = arith.constant 0 : index
    %c0_24 = arith.constant 0 : index
    %48 = vector.load %arg5[%c1_22, %c0_23, %c0_24] : memref<5x32x32xbf16, #tpu.memory_space<vmem>>, vector<1x32x32xbf16>
    %49 = vector.shape_cast %48 : vector<1x32x32xbf16> to vector<32x32xbf16>
    %50 = arith.truncf %47 : vector<32x32xf32> to vector<32x32xbf16>
    %cst_25 = arith.constant dense<0.000000e+00> : vector<32x32xf32>
    %51 = tpu.matmul %50, %49, %cst_25 {dimension_numbers = #tpu.dot_dimension_numbers<[1], [0], [0], [1], [0, 0, 1, 1], [], []>} : vector<32x32xbf16>, vector<32x32xbf16>, vector<32x32xf32> -> vector<32x32xf32>
    %c4 = arith.constant 4 : index
    %c0_26 = arith.constant 0 : index
    %52 = vector.load %arg6[%c4, %c0_26] : memref<17x32xf32, #tpu.memory_space<vmem>>, vector<1x32xf32>
    %53 = vector.shape_cast %52 : vector<1x32xf32> to vector<32xf32>
    %54 = vector.shape_cast %53 : vector<32xf32> to vector<1x32xf32>
    %55 = vector.broadcast %54 : vector<1x32xf32> to vector<32x32xf32>
    %56 = arith.addf %51, %55 : vector<32x32xf32>
    %57 = arith.addf %56, %3 : vector<32x32xf32>
    %c5 = arith.constant 5 : index
    %c0_27 = arith.constant 0 : index
    %58 = vector.load %arg6[%c5, %c0_27] : memref<17x32xf32, #tpu.memory_space<vmem>>, vector<1x32xf32>
    %59 = vector.shape_cast %58 : vector<1x32xf32> to vector<32xf32>
    %c6 = arith.constant 6 : index
    %c0_28 = arith.constant 0 : index
    %60 = vector.load %arg6[%c6, %c0_28] : memref<17x32xf32, #tpu.memory_space<vmem>>, vector<1x32xf32>
    %61 = vector.shape_cast %60 : vector<1x32xf32> to vector<32xf32>
    %cst_29 = arith.constant dense<0.000000e+00> : vector<32xf32>
    %62 = vector.multi_reduction <add>, %57, %cst_29 [1] : vector<32x32xf32> to vector<32xf32>
    %63 = vector.shape_cast %62 : vector<32xf32> to vector<32x1xf32>
    %cst_30 = arith.constant 3.200000e+01 : f32
    %64 = vector.broadcast %cst_30 : f32 to vector<32x1xf32>
    %65 = arith.divf %63, %64 : vector<32x1xf32>
    %66 = vector.broadcast %65 : vector<32x1xf32> to vector<32x32xf32>
    %67 = arith.subf %57, %66 : vector<32x32xf32>
    %68 = arith.mulf %67, %67 : vector<32x32xf32>
    %cst_31 = arith.constant dense<0.000000e+00> : vector<32xf32>
    %69 = vector.multi_reduction <add>, %68, %cst_31 [1] : vector<32x32xf32> to vector<32xf32>
    %70 = vector.shape_cast %69 : vector<32xf32> to vector<32x1xf32>
    %cst_32 = arith.constant 3.200000e+01 : f32
    %71 = vector.broadcast %cst_32 : f32 to vector<32x1xf32>
    %72 = arith.divf %70, %71 : vector<32x1xf32>
    %cst_33 = arith.constant 9.99999974E-6 : f32
    %73 = vector.broadcast %cst_33 : f32 to vector<32x1xf32>
    %74 = arith.addf %72, %73 : vector<32x1xf32>
    %75 = math.rsqrt %74 : vector<32x1xf32>
    %76 = vector.broadcast %75 : vector<32x1xf32> to vector<32x32xf32>
    %77 = arith.mulf %67, %76 : vector<32x32xf32>
    %78 = vector.shape_cast %59 : vector<32xf32> to vector<1x32xf32>
    %79 = vector.broadcast %78 : vector<1x32xf32> to vector<32x32xf32>
    %80 = arith.mulf %77, %79 : vector<32x32xf32>
    %81 = vector.shape_cast %61 : vector<32xf32> to vector<1x32xf32>
    %82 = vector.broadcast %81 : vector<1x32xf32> to vector<32x32xf32>
    %83 = arith.addf %80, %82 : vector<32x32xf32>
    %c0_34 = arith.constant 0 : index
    %c0_35 = arith.constant 0 : index
    %84 = vector.load %arg4[%c0_34, %c0_35] : memref<32x96xbf16, #tpu.memory_space<vmem>>, vector<32x96xbf16>
    %85 = arith.truncf %83 : vector<32x32xf32> to vector<32x32xbf16>
    %cst_36 = arith.constant dense<0.000000e+00> : vector<32x96xf32>
    %86 = tpu.matmul %85, %84, %cst_36 {dimension_numbers = #tpu.dot_dimension_numbers<[1], [0], [0], [1], [0, 0, 1, 1], [], []>} : vector<32x32xbf16>, vector<32x96xbf16>, vector<32x96xf32> -> vector<32x96xf32>
    %87 = vector.extract_strided_slice %86 {offsets = [0, 0], sizes = [32, 32], strides = [1, 1]} : vector<32x96xf32> to vector<32x32xf32>
    %c7 = arith.constant 7 : index
    %c0_37 = arith.constant 0 : index
    %88 = vector.load %arg6[%c7, %c0_37] : memref<17x32xf32, #tpu.memory_space<vmem>>, vector<1x32xf32>
    %89 = vector.shape_cast %88 : vector<1x32xf32> to vector<32xf32>
    %90 = vector.shape_cast %89 : vector<32xf32> to vector<1x32xf32>
    %91 = vector.broadcast %90 : vector<1x32xf32> to vector<32x32xf32>
    %92 = arith.addf %87, %91 : vector<32x32xf32>
    %93 = vector.extract_strided_slice %86 {offsets = [0, 32], sizes = [32, 32], strides = [1, 1]} : vector<32x96xf32> to vector<32x32xf32>
    %c8 = arith.constant 8 : index
    %c0_38 = arith.constant 0 : index
    %94 = vector.load %arg6[%c8, %c0_38] : memref<17x32xf32, #tpu.memory_space<vmem>>, vector<1x32xf32>
    %95 = vector.shape_cast %94 : vector<1x32xf32> to vector<32xf32>
    %96 = vector.shape_cast %95 : vector<32xf32> to vector<1x32xf32>
    %97 = vector.broadcast %96 : vector<1x32xf32> to vector<32x32xf32>
    %98 = arith.addf %93, %97 : vector<32x32xf32>
    %99 = vector.extract_strided_slice %86 {offsets = [0, 64], sizes = [32, 32], strides = [1, 1]} : vector<32x96xf32> to vector<32x32xf32>
    %c9 = arith.constant 9 : index
    %c0_39 = arith.constant 0 : index
    %100 = vector.load %arg6[%c9, %c0_39] : memref<17x32xf32, #tpu.memory_space<vmem>>, vector<1x32xf32>
    %101 = vector.shape_cast %100 : vector<1x32xf32> to vector<32xf32>
    %102 = vector.shape_cast %101 : vector<32xf32> to vector<1x32xf32>
    %103 = vector.broadcast %102 : vector<1x32xf32> to vector<32x32xf32>
    %104 = arith.addf %99, %103 : vector<32x32xf32>
    %c2_40 = arith.constant 2 : index
    %c0_41 = arith.constant 0 : index
    %c0_42 = arith.constant 0 : index
    %105 = vector.load %arg5[%c2_40, %c0_41, %c0_42] : memref<5x32x32xbf16, #tpu.memory_space<vmem>>, vector<1x32x32xbf16>
    %106 = vector.shape_cast %105 : vector<1x32x32xbf16> to vector<32x32xbf16>
    %cst_43 = arith.constant 0.000000e+00 : f32
    %107 = vector.broadcast %cst_43 : f32 to vector<32x32xf32>
    %108 = vector.extract_strided_slice %92 {offsets = [0, 0], sizes = [32, 8], strides = [1, 1]} : vector<32x32xf32> to vector<32x8xf32>
    %109 = vector.shape_cast %108 : vector<32x8xf32> to vector<4x8x8xf32>
    %110 = arith.truncf %109 : vector<4x8x8xf32> to vector<4x8x8xbf16>
    %111 = vector.extract_strided_slice %98 {offsets = [0, 0], sizes = [32, 8], strides = [1, 1]} : vector<32x32xf32> to vector<32x8xf32>
    %112 = vector.shape_cast %111 : vector<32x8xf32> to vector<4x8x8xf32>
    %113 = arith.truncf %112 : vector<4x8x8xf32> to vector<4x8x8xbf16>
    %114 = vector.extract_strided_slice %104 {offsets = [0, 0], sizes = [32, 8], strides = [1, 1]} : vector<32x32xf32> to vector<32x8xf32>
    %115 = vector.shape_cast %114 : vector<32x8xf32> to vector<4x8x8xf32>
    %116 = arith.truncf %115 : vector<4x8x8xf32> to vector<4x8x8xbf16>
    %cst_44 = arith.constant dense<0.000000e+00> : vector<4x8x8xf32>
    %117 = tpu.matmul %110, %113, %cst_44 {dimension_numbers = #tpu.dot_dimension_numbers<[2], [2], [1], [1], [0, 0, 0, 1, 1, 1], [0], [0]>} : vector<4x8x8xbf16>, vector<4x8x8xbf16>, vector<4x8x8xf32> -> vector<4x8x8xf32>
    %cst_45 = arith.constant 0.353553385 : f32
    %118 = vector.broadcast %cst_45 : f32 to vector<4x8x8xf32>
    %119 = arith.mulf %117, %118 : vector<4x8x8xf32>
    %cst_46 = arith.constant dense<0xFF800000> : vector<4x8xf32>
    %120 = vector.multi_reduction <maximumf>, %119, %cst_46 [2] : vector<4x8x8xf32> to vector<4x8xf32>
    %121 = vector.shape_cast %120 : vector<4x8xf32> to vector<4x8x1xf32>
    %122 = vector.broadcast %121 : vector<4x8x1xf32> to vector<4x8x8xf32>
    %123 = arith.subf %119, %122 : vector<4x8x8xf32>
    %124 = math.exp %123 : vector<4x8x8xf32>
    %cst_47 = arith.constant dense<0.000000e+00> : vector<4x8xf32>
    %125 = vector.multi_reduction <add>, %124, %cst_47 [2] : vector<4x8x8xf32> to vector<4x8xf32>
    %126 = vector.shape_cast %125 : vector<4x8xf32> to vector<4x8x1xf32>
    %127 = tpu.reciprocal %126 {approx = true} : vector<4x8x1xf32> -> vector<4x8x1xf32>
    %128 = vector.broadcast %127 : vector<4x8x1xf32> to vector<4x8x8xf32>
    %129 = arith.mulf %124, %128 : vector<4x8x8xf32>
    %130 = arith.truncf %129 : vector<4x8x8xf32> to vector<4x8x8xbf16>
    %cst_48 = arith.constant dense<0.000000e+00> : vector<4x8x8xf32>
    %131 = tpu.matmul %130, %116, %cst_48 {dimension_numbers = #tpu.dot_dimension_numbers<[2], [1], [1], [2], [0, 0, 0, 1, 1, 2], [0], [0]>} : vector<4x8x8xbf16>, vector<4x8x8xbf16>, vector<4x8x8xf32> -> vector<4x8x8xf32>
    %132 = vector.shape_cast %131 : vector<4x8x8xf32> to vector<32x8xf32>
    %133 = arith.truncf %132 : vector<32x8xf32> to vector<32x8xbf16>
    %134 = vector.extract_strided_slice %106 {offsets = [0, 0], sizes = [8, 32], strides = [1, 1]} : vector<32x32xbf16> to vector<8x32xbf16>
    %cst_49 = arith.constant dense<0.000000e+00> : vector<32x32xf32>
    %135 = tpu.matmul %133, %134, %cst_49 {dimension_numbers = #tpu.dot_dimension_numbers<[1], [0], [0], [1], [0, 0, 1, 1], [], []>} : vector<32x8xbf16>, vector<8x32xbf16>, vector<32x32xf32> -> vector<32x32xf32>
    %136 = arith.addf %107, %135 : vector<32x32xf32>
    %137 = vector.extract_strided_slice %92 {offsets = [0, 8], sizes = [32, 8], strides = [1, 1]} : vector<32x32xf32> to vector<32x8xf32>
    %138 = vector.shape_cast %137 : vector<32x8xf32> to vector<4x8x8xf32>
    %139 = arith.truncf %138 : vector<4x8x8xf32> to vector<4x8x8xbf16>
    %140 = vector.extract_strided_slice %98 {offsets = [0, 8], sizes = [32, 8], strides = [1, 1]} : vector<32x32xf32> to vector<32x8xf32>
    %141 = vector.shape_cast %140 : vector<32x8xf32> to vector<4x8x8xf32>
    %142 = arith.truncf %141 : vector<4x8x8xf32> to vector<4x8x8xbf16>
    %143 = vector.extract_strided_slice %104 {offsets = [0, 8], sizes = [32, 8], strides = [1, 1]} : vector<32x32xf32> to vector<32x8xf32>
    %144 = vector.shape_cast %143 : vector<32x8xf32> to vector<4x8x8xf32>
    %145 = arith.truncf %144 : vector<4x8x8xf32> to vector<4x8x8xbf16>
    %cst_50 = arith.constant dense<0.000000e+00> : vector<4x8x8xf32>
    %146 = tpu.matmul %139, %142, %cst_50 {dimension_numbers = #tpu.dot_dimension_numbers<[2], [2], [1], [1], [0, 0, 0, 1, 1, 1], [0], [0]>} : vector<4x8x8xbf16>, vector<4x8x8xbf16>, vector<4x8x8xf32> -> vector<4x8x8xf32>
    %cst_51 = arith.constant 0.353553385 : f32
    %147 = vector.broadcast %cst_51 : f32 to vector<4x8x8xf32>
    %148 = arith.mulf %146, %147 : vector<4x8x8xf32>
    %cst_52 = arith.constant dense<0xFF800000> : vector<4x8xf32>
    %149 = vector.multi_reduction <maximumf>, %148, %cst_52 [2] : vector<4x8x8xf32> to vector<4x8xf32>
    %150 = vector.shape_cast %149 : vector<4x8xf32> to vector<4x8x1xf32>
    %151 = vector.broadcast %150 : vector<4x8x1xf32> to vector<4x8x8xf32>
    %152 = arith.subf %148, %151 : vector<4x8x8xf32>
    %153 = math.exp %152 : vector<4x8x8xf32>
    %cst_53 = arith.constant dense<0.000000e+00> : vector<4x8xf32>
    %154 = vector.multi_reduction <add>, %153, %cst_53 [2] : vector<4x8x8xf32> to vector<4x8xf32>
    %155 = vector.shape_cast %154 : vector<4x8xf32> to vector<4x8x1xf32>
    %156 = tpu.reciprocal %155 {approx = true} : vector<4x8x1xf32> -> vector<4x8x1xf32>
    %157 = vector.broadcast %156 : vector<4x8x1xf32> to vector<4x8x8xf32>
    %158 = arith.mulf %153, %157 : vector<4x8x8xf32>
    %159 = arith.truncf %158 : vector<4x8x8xf32> to vector<4x8x8xbf16>
    %cst_54 = arith.constant dense<0.000000e+00> : vector<4x8x8xf32>
    %160 = tpu.matmul %159, %145, %cst_54 {dimension_numbers = #tpu.dot_dimension_numbers<[2], [1], [1], [2], [0, 0, 0, 1, 1, 2], [0], [0]>} : vector<4x8x8xbf16>, vector<4x8x8xbf16>, vector<4x8x8xf32> -> vector<4x8x8xf32>
    %161 = vector.shape_cast %160 : vector<4x8x8xf32> to vector<32x8xf32>
    %162 = arith.truncf %161 : vector<32x8xf32> to vector<32x8xbf16>
    %163 = vector.extract_strided_slice %106 {offsets = [8, 0], sizes = [8, 32], strides = [1, 1]} : vector<32x32xbf16> to vector<8x32xbf16>
    %cst_55 = arith.constant dense<0.000000e+00> : vector<32x32xf32>
    %164 = tpu.matmul %162, %163, %cst_55 {dimension_numbers = #tpu.dot_dimension_numbers<[1], [0], [0], [1], [0, 0, 1, 1], [], []>} : vector<32x8xbf16>, vector<8x32xbf16>, vector<32x32xf32> -> vector<32x32xf32>
    %165 = arith.addf %136, %164 : vector<32x32xf32>
    %166 = vector.extract_strided_slice %92 {offsets = [0, 16], sizes = [32, 8], strides = [1, 1]} : vector<32x32xf32> to vector<32x8xf32>
    %167 = vector.shape_cast %166 : vector<32x8xf32> to vector<4x8x8xf32>
    %168 = arith.truncf %167 : vector<4x8x8xf32> to vector<4x8x8xbf16>
    %169 = vector.extract_strided_slice %98 {offsets = [0, 16], sizes = [32, 8], strides = [1, 1]} : vector<32x32xf32> to vector<32x8xf32>
    %170 = vector.shape_cast %169 : vector<32x8xf32> to vector<4x8x8xf32>
    %171 = arith.truncf %170 : vector<4x8x8xf32> to vector<4x8x8xbf16>
    %172 = vector.extract_strided_slice %104 {offsets = [0, 16], sizes = [32, 8], strides = [1, 1]} : vector<32x32xf32> to vector<32x8xf32>
    %173 = vector.shape_cast %172 : vector<32x8xf32> to vector<4x8x8xf32>
    %174 = arith.truncf %173 : vector<4x8x8xf32> to vector<4x8x8xbf16>
    %cst_56 = arith.constant dense<0.000000e+00> : vector<4x8x8xf32>
    %175 = tpu.matmul %168, %171, %cst_56 {dimension_numbers = #tpu.dot_dimension_numbers<[2], [2], [1], [1], [0, 0, 0, 1, 1, 1], [0], [0]>} : vector<4x8x8xbf16>, vector<4x8x8xbf16>, vector<4x8x8xf32> -> vector<4x8x8xf32>
    %cst_57 = arith.constant 0.353553385 : f32
    %176 = vector.broadcast %cst_57 : f32 to vector<4x8x8xf32>
    %177 = arith.mulf %175, %176 : vector<4x8x8xf32>
    %cst_58 = arith.constant dense<0xFF800000> : vector<4x8xf32>
    %178 = vector.multi_reduction <maximumf>, %177, %cst_58 [2] : vector<4x8x8xf32> to vector<4x8xf32>
    %179 = vector.shape_cast %178 : vector<4x8xf32> to vector<4x8x1xf32>
    %180 = vector.broadcast %179 : vector<4x8x1xf32> to vector<4x8x8xf32>
    %181 = arith.subf %177, %180 : vector<4x8x8xf32>
    %182 = math.exp %181 : vector<4x8x8xf32>
    %cst_59 = arith.constant dense<0.000000e+00> : vector<4x8xf32>
    %183 = vector.multi_reduction <add>, %182, %cst_59 [2] : vector<4x8x8xf32> to vector<4x8xf32>
    %184 = vector.shape_cast %183 : vector<4x8xf32> to vector<4x8x1xf32>
    %185 = tpu.reciprocal %184 {approx = true} : vector<4x8x1xf32> -> vector<4x8x1xf32>
    %186 = vector.broadcast %185 : vector<4x8x1xf32> to vector<4x8x8xf32>
    %187 = arith.mulf %182, %186 : vector<4x8x8xf32>
    %188 = arith.truncf %187 : vector<4x8x8xf32> to vector<4x8x8xbf16>
    %cst_60 = arith.constant dense<0.000000e+00> : vector<4x8x8xf32>
    %189 = tpu.matmul %188, %174, %cst_60 {dimension_numbers = #tpu.dot_dimension_numbers<[2], [1], [1], [2], [0, 0, 0, 1, 1, 2], [0], [0]>} : vector<4x8x8xbf16>, vector<4x8x8xbf16>, vector<4x8x8xf32> -> vector<4x8x8xf32>
    %190 = vector.shape_cast %189 : vector<4x8x8xf32> to vector<32x8xf32>
    %191 = arith.truncf %190 : vector<32x8xf32> to vector<32x8xbf16>
    %192 = vector.extract_strided_slice %106 {offsets = [16, 0], sizes = [8, 32], strides = [1, 1]} : vector<32x32xbf16> to vector<8x32xbf16>
    %cst_61 = arith.constant dense<0.000000e+00> : vector<32x32xf32>
    %193 = tpu.matmul %191, %192, %cst_61 {dimension_numbers = #tpu.dot_dimension_numbers<[1], [0], [0], [1], [0, 0, 1, 1], [], []>} : vector<32x8xbf16>, vector<8x32xbf16>, vector<32x32xf32> -> vector<32x32xf32>
    %194 = arith.addf %165, %193 : vector<32x32xf32>
    %195 = vector.extract_strided_slice %92 {offsets = [0, 24], sizes = [32, 8], strides = [1, 1]} : vector<32x32xf32> to vector<32x8xf32>
    %196 = vector.shape_cast %195 : vector<32x8xf32> to vector<4x8x8xf32>
    %197 = arith.truncf %196 : vector<4x8x8xf32> to vector<4x8x8xbf16>
    %198 = vector.extract_strided_slice %98 {offsets = [0, 24], sizes = [32, 8], strides = [1, 1]} : vector<32x32xf32> to vector<32x8xf32>
    %199 = vector.shape_cast %198 : vector<32x8xf32> to vector<4x8x8xf32>
    %200 = arith.truncf %199 : vector<4x8x8xf32> to vector<4x8x8xbf16>
    %201 = vector.extract_strided_slice %104 {offsets = [0, 24], sizes = [32, 8], strides = [1, 1]} : vector<32x32xf32> to vector<32x8xf32>
    %202 = vector.shape_cast %201 : vector<32x8xf32> to vector<4x8x8xf32>
    %203 = arith.truncf %202 : vector<4x8x8xf32> to vector<4x8x8xbf16>
    %cst_62 = arith.constant dense<0.000000e+00> : vector<4x8x8xf32>
    %204 = tpu.matmul %197, %200, %cst_62 {dimension_numbers = #tpu.dot_dimension_numbers<[2], [2], [1], [1], [0, 0, 0, 1, 1, 1], [0], [0]>} : vector<4x8x8xbf16>, vector<4x8x8xbf16>, vector<4x8x8xf32> -> vector<4x8x8xf32>
    %cst_63 = arith.constant 0.353553385 : f32
    %205 = vector.broadcast %cst_63 : f32 to vector<4x8x8xf32>
    %206 = arith.mulf %204, %205 : vector<4x8x8xf32>
    %cst_64 = arith.constant dense<0xFF800000> : vector<4x8xf32>
    %207 = vector.multi_reduction <maximumf>, %206, %cst_64 [2] : vector<4x8x8xf32> to vector<4x8xf32>
    %208 = vector.shape_cast %207 : vector<4x8xf32> to vector<4x8x1xf32>
    %209 = vector.broadcast %208 : vector<4x8x1xf32> to vector<4x8x8xf32>
    %210 = arith.subf %206, %209 : vector<4x8x8xf32>
    %211 = math.exp %210 : vector<4x8x8xf32>
    %cst_65 = arith.constant dense<0.000000e+00> : vector<4x8xf32>
    %212 = vector.multi_reduction <add>, %211, %cst_65 [2] : vector<4x8x8xf32> to vector<4x8xf32>
    %213 = vector.shape_cast %212 : vector<4x8xf32> to vector<4x8x1xf32>
    %214 = tpu.reciprocal %213 {approx = true} : vector<4x8x1xf32> -> vector<4x8x1xf32>
    %215 = vector.broadcast %214 : vector<4x8x1xf32> to vector<4x8x8xf32>
    %216 = arith.mulf %211, %215 : vector<4x8x8xf32>
    %217 = arith.truncf %216 : vector<4x8x8xf32> to vector<4x8x8xbf16>
    %cst_66 = arith.constant dense<0.000000e+00> : vector<4x8x8xf32>
    %218 = tpu.matmul %217, %203, %cst_66 {dimension_numbers = #tpu.dot_dimension_numbers<[2], [1], [1], [2], [0, 0, 0, 1, 1, 2], [0], [0]>} : vector<4x8x8xbf16>, vector<4x8x8xbf16>, vector<4x8x8xf32> -> vector<4x8x8xf32>
    %219 = vector.shape_cast %218 : vector<4x8x8xf32> to vector<32x8xf32>
    %220 = arith.truncf %219 : vector<32x8xf32> to vector<32x8xbf16>
    %221 = vector.extract_strided_slice %106 {offsets = [24, 0], sizes = [8, 32], strides = [1, 1]} : vector<32x32xbf16> to vector<8x32xbf16>
    %cst_67 = arith.constant dense<0.000000e+00> : vector<32x32xf32>
    %222 = tpu.matmul %220, %221, %cst_67 {dimension_numbers = #tpu.dot_dimension_numbers<[1], [0], [0], [1], [0, 0, 1, 1], [], []>} : vector<32x8xbf16>, vector<8x32xbf16>, vector<32x32xf32> -> vector<32x32xf32>
    %223 = arith.addf %194, %222 : vector<32x32xf32>
    %c10 = arith.constant 10 : index
    %c0_68 = arith.constant 0 : index
    %224 = vector.load %arg6[%c10, %c0_68] : memref<17x32xf32, #tpu.memory_space<vmem>>, vector<1x32xf32>
    %225 = vector.shape_cast %224 : vector<1x32xf32> to vector<32xf32>
    %226 = vector.shape_cast %225 : vector<32xf32> to vector<1x32xf32>
    %227 = vector.broadcast %226 : vector<1x32xf32> to vector<32x32xf32>
    %228 = arith.addf %223, %227 : vector<32x32xf32>
    %229 = arith.addf %228, %83 : vector<32x32xf32>
    %c11 = arith.constant 11 : index
    %c0_69 = arith.constant 0 : index
    %230 = vector.load %arg6[%c11, %c0_69] : memref<17x32xf32, #tpu.memory_space<vmem>>, vector<1x32xf32>
    %231 = vector.shape_cast %230 : vector<1x32xf32> to vector<32xf32>
    %c12 = arith.constant 12 : index
    %c0_70 = arith.constant 0 : index
    %232 = vector.load %arg6[%c12, %c0_70] : memref<17x32xf32, #tpu.memory_space<vmem>>, vector<1x32xf32>
    %233 = vector.shape_cast %232 : vector<1x32xf32> to vector<32xf32>
    %cst_71 = arith.constant dense<0.000000e+00> : vector<32xf32>
    %234 = vector.multi_reduction <add>, %229, %cst_71 [1] : vector<32x32xf32> to vector<32xf32>
    %235 = vector.shape_cast %234 : vector<32xf32> to vector<32x1xf32>
    %cst_72 = arith.constant 3.200000e+01 : f32
    %236 = vector.broadcast %cst_72 : f32 to vector<32x1xf32>
    %237 = arith.divf %235, %236 : vector<32x1xf32>
    %238 = vector.broadcast %237 : vector<32x1xf32> to vector<32x32xf32>
    %239 = arith.subf %229, %238 : vector<32x32xf32>
    %240 = arith.mulf %239, %239 : vector<32x32xf32>
    %cst_73 = arith.constant dense<0.000000e+00> : vector<32xf32>
    %241 = vector.multi_reduction <add>, %240, %cst_73 [1] : vector<32x32xf32> to vector<32xf32>
    %242 = vector.shape_cast %241 : vector<32xf32> to vector<32x1xf32>
    %cst_74 = arith.constant 3.200000e+01 : f32
    %243 = vector.broadcast %cst_74 : f32 to vector<32x1xf32>
    %244 = arith.divf %242, %243 : vector<32x1xf32>
    %cst_75 = arith.constant 9.99999974E-6 : f32
    %245 = vector.broadcast %cst_75 : f32 to vector<32x1xf32>
    %246 = arith.addf %244, %245 : vector<32x1xf32>
    %247 = math.rsqrt %246 : vector<32x1xf32>
    %248 = vector.broadcast %247 : vector<32x1xf32> to vector<32x32xf32>
    %249 = arith.mulf %239, %248 : vector<32x32xf32>
    %250 = vector.shape_cast %231 : vector<32xf32> to vector<1x32xf32>
    %251 = vector.broadcast %250 : vector<1x32xf32> to vector<32x32xf32>
    %252 = arith.mulf %249, %251 : vector<32x32xf32>
    %253 = vector.shape_cast %233 : vector<32xf32> to vector<1x32xf32>
    %254 = vector.broadcast %253 : vector<1x32xf32> to vector<32x32xf32>
    %255 = arith.addf %252, %254 : vector<32x32xf32>
    %c3_76 = arith.constant 3 : index
    %c0_77 = arith.constant 0 : index
    %c0_78 = arith.constant 0 : index
    %256 = vector.load %arg5[%c3_76, %c0_77, %c0_78] : memref<5x32x32xbf16, #tpu.memory_space<vmem>>, vector<1x32x32xbf16>
    %257 = vector.shape_cast %256 : vector<1x32x32xbf16> to vector<32x32xbf16>
    %258 = arith.truncf %255 : vector<32x32xf32> to vector<32x32xbf16>
    %cst_79 = arith.constant dense<0.000000e+00> : vector<32x32xf32>
    %259 = tpu.matmul %258, %257, %cst_79 {dimension_numbers = #tpu.dot_dimension_numbers<[1], [0], [0], [1], [0, 0, 1, 1], [], []>} : vector<32x32xbf16>, vector<32x32xbf16>, vector<32x32xf32> -> vector<32x32xf32>
    %c13 = arith.constant 13 : index
    %c0_80 = arith.constant 0 : index
    %260 = vector.load %arg6[%c13, %c0_80] : memref<17x32xf32, #tpu.memory_space<vmem>>, vector<1x32xf32>
    %261 = vector.shape_cast %260 : vector<1x32xf32> to vector<32xf32>
    %262 = vector.shape_cast %261 : vector<32xf32> to vector<1x32xf32>
    %263 = vector.broadcast %262 : vector<1x32xf32> to vector<32x32xf32>
    %264 = arith.addf %259, %263 : vector<32x32xf32>
    %cst_81 = arith.constant 0.000000e+00 : f32
    %265 = vector.broadcast %cst_81 : f32 to vector<32x32xf32>
    %266 = arith.maximumf %264, %265 : vector<32x32xf32>
    %c4_82 = arith.constant 4 : index
    %c0_83 = arith.constant 0 : index
    %c0_84 = arith.constant 0 : index
    %267 = vector.load %arg5[%c4_82, %c0_83, %c0_84] : memref<5x32x32xbf16, #tpu.memory_space<vmem>>, vector<1x32x32xbf16>
    %268 = vector.shape_cast %267 : vector<1x32x32xbf16> to vector<32x32xbf16>
    %269 = arith.truncf %266 : vector<32x32xf32> to vector<32x32xbf16>
    %cst_85 = arith.constant dense<0.000000e+00> : vector<32x32xf32>
    %270 = tpu.matmul %269, %268, %cst_85 {dimension_numbers = #tpu.dot_dimension_numbers<[1], [0], [0], [1], [0, 0, 1, 1], [], []>} : vector<32x32xbf16>, vector<32x32xbf16>, vector<32x32xf32> -> vector<32x32xf32>
    %c14 = arith.constant 14 : index
    %c0_86 = arith.constant 0 : index
    %271 = vector.load %arg6[%c14, %c0_86] : memref<17x32xf32, #tpu.memory_space<vmem>>, vector<1x32xf32>
    %272 = vector.shape_cast %271 : vector<1x32xf32> to vector<32xf32>
    %273 = vector.shape_cast %272 : vector<32xf32> to vector<1x32xf32>
    %274 = vector.broadcast %273 : vector<1x32xf32> to vector<32x32xf32>
    %275 = arith.addf %270, %274 : vector<32x32xf32>
    %276 = arith.addf %275, %255 : vector<32x32xf32>
    %c15 = arith.constant 15 : index
    %c0_87 = arith.constant 0 : index
    %277 = vector.load %arg6[%c15, %c0_87] : memref<17x32xf32, #tpu.memory_space<vmem>>, vector<1x32xf32>
    %278 = vector.shape_cast %277 : vector<1x32xf32> to vector<32xf32>
    %c16 = arith.constant 16 : index
    %c0_88 = arith.constant 0 : index
    %279 = vector.load %arg6[%c16, %c0_88] : memref<17x32xf32, #tpu.memory_space<vmem>>, vector<1x32xf32>
    %280 = vector.shape_cast %279 : vector<1x32xf32> to vector<32xf32>
    %cst_89 = arith.constant dense<0.000000e+00> : vector<32xf32>
    %281 = vector.multi_reduction <add>, %276, %cst_89 [1] : vector<32x32xf32> to vector<32xf32>
    %282 = vector.shape_cast %281 : vector<32xf32> to vector<32x1xf32>
    %cst_90 = arith.constant 3.200000e+01 : f32
    %283 = vector.broadcast %cst_90 : f32 to vector<32x1xf32>
    %284 = arith.divf %282, %283 : vector<32x1xf32>
    %285 = vector.broadcast %284 : vector<32x1xf32> to vector<32x32xf32>
    %286 = arith.subf %276, %285 : vector<32x32xf32>
    %287 = arith.mulf %286, %286 : vector<32x32xf32>
    %cst_91 = arith.constant dense<0.000000e+00> : vector<32xf32>
    %288 = vector.multi_reduction <add>, %287, %cst_91 [1] : vector<32x32xf32> to vector<32xf32>
    %289 = vector.shape_cast %288 : vector<32xf32> to vector<32x1xf32>
    %cst_92 = arith.constant 3.200000e+01 : f32
    %290 = vector.broadcast %cst_92 : f32 to vector<32x1xf32>
    %291 = arith.divf %289, %290 : vector<32x1xf32>
    %cst_93 = arith.constant 9.99999974E-6 : f32
    %292 = vector.broadcast %cst_93 : f32 to vector<32x1xf32>
    %293 = arith.addf %291, %292 : vector<32x1xf32>
    %294 = math.rsqrt %293 : vector<32x1xf32>
    %295 = vector.broadcast %294 : vector<32x1xf32> to vector<32x32xf32>
    %296 = arith.mulf %286, %295 : vector<32x32xf32>
    %297 = vector.shape_cast %278 : vector<32xf32> to vector<1x32xf32>
    %298 = vector.broadcast %297 : vector<1x32xf32> to vector<32x32xf32>
    %299 = arith.mulf %296, %298 : vector<32x32xf32>
    %300 = vector.shape_cast %280 : vector<32xf32> to vector<1x32xf32>
    %301 = vector.broadcast %300 : vector<1x32xf32> to vector<32x32xf32>
    %302 = arith.addf %299, %301 : vector<32x32xf32>
    %c0_94 = arith.constant 0 : index
    %c0_95 = arith.constant 0 : index
    %c0_96 = arith.constant 0 : index
    %303 = vector.load %arg7[%c0_94, %c0_95, %c0_96] : memref<1x32x32xf32, #tpu.memory_space<vmem>>, vector<1x32x32xf32>
    %304 = vector.shape_cast %303 : vector<1x32x32xf32> to vector<32x32xf32>
    %305 = vector.shape_cast %302 : vector<32x32xf32> to vector<1x32x32xf32>
    tpu.vector_store %arg7[%c0_94, %c0_95, %c0_96], %305 {strides = array<i32>} : memref<1x32x32xf32, #tpu.memory_space<vmem>>, vector<1x32x32xf32>,
    return
  }
  func.func @transform_0(%arg0: i32) -> (i32, i32, i32) {
    %c0_i32 = arith.constant 0 : i32
    %c0_i32_0 = arith.constant 0 : i32
    %c0_i32_1 = arith.constant 0 : i32
    return %arg0, %c0_i32, %c0_i32_0 : i32, i32, i32
  }
  func.func @transform_1(%arg0: i32) -> (i32, i32, i32) {
    %c0_i32 = arith.constant 0 : i32
    %c0_i32_0 = arith.constant 0 : i32
    %c0_i32_1 = arith.constant 0 : i32
    return %arg0, %c0_i32, %c0_i32_0 : i32, i32, i32
  }
  func.func @transform_2(%arg0: i32) -> (i32, i32) {
    %c0_i32 = arith.constant 0 : i32
    %c0_i32_0 = arith.constant 0 : i32
    %c0_i32_1 = arith.constant 0 : i32
    return %c0_i32, %c0_i32_0 : i32, i32
  }
  func.func @transform_3(%arg0: i32) -> (i32, i32) {
    %c0_i32 = arith.constant 0 : i32
    %c0_i32_0 = arith.constant 0 : i32
    %c0_i32_1 = arith.constant 0 : i32
    return %c0_i32, %c0_i32_0 : i32, i32
  }
  func.func @transform_4(%arg0: i32) -> (i32, i32, i32) {
    %c0_i32 = arith.constant 0 : i32
    %c0_i32_0 = arith.constant 0 : i32
    %c0_i32_1 = arith.constant 0 : i32
    %c0_i32_2 = arith.constant 0 : i32
    return %c0_i32, %c0_i32_0, %c0_i32_1 : i32, i32, i32
  }
  func.func @transform_5(%arg0: i32) -> (i32, i32) {
    %c0_i32 = arith.constant 0 : i32
    %c0_i32_0 = arith.constant 0 : i32
    %c0_i32_1 = arith.constant 0 : i32
    return %c0_i32, %c0_i32_0 : i32, i32
  }
  func.func @transform_6(%arg0: i32) -> (i32, i32, i32) {
    %c0_i32 = arith.constant 0 : i32
    %c0_i32_0 = arith.constant 0 : i32
    %c0_i32_1 = arith.constant 0 : i32
    return %arg0, %c0_i32, %c0_i32_0 : i32, i32, i32
  }
}

</mosaic_0001>

<bundles_post_ra>
// kernel: tpu_custom_call.1
= control target key start
LH: loop header
LB: loop body
LE: loop exit
PB: predicated region body
PF: predicated region fallthrough
CT: control target
= control target key end

     0   :  { %11 = vsyncpa [#allocation3], 0  ;;  %s5199_s0 = inlined_call_operand.vmem [shape: bf16[2,32,288], index: 0, kind: input, shape index: {}]   ;;  %s5200_s1 = inlined_call_operand.hbm [shape: f32[2,32,32], index: 1, kind: input, shape index: {}]   ;;  %s5201_s2 = inlined_call_operand.vmem [shape: bf16[288,32], index: 2, kind: input, shape index: {}]   ;;  %s5202_s3 = inlined_call_operand.hbm [shape: bf16[32,96], index: 3, kind: input, shape index: {}]   ;;  %s5203_s4 = inlined_call_operand.vmem [shape: bf16[5,32,32], index: 4, kind: input, shape index: {}]   ;;  %s5204_s5 = inlined_call_operand.vmem [shape: f32[17,32], index: 5, kind: input, shape index: {}]   ;;  %s5205_s6 = inlined_call_operand.hbm [shape: f32[2,32,32], index: 6, kind: output, shape index: {}]  }
   0x1   :  { %13 = vsyncpa [#allocation3 + $0x1], 0 }
   0x2   :  { %14 = vsyncpa [#allocation6], 0 }
   0x3   :  { %15 = vsyncpa [#allocation4], 0 }
   0x4   :  { %17 = vsyncpa [#allocation4 + $0x1], 0  ;;  %s4439_s21 = smov 0   ;;  %s4441_s22 = smov 0  }
   0x5   :  { %s4443_s23 = smov 0   ;;  %s4445_s24 = smov 0  }
   0x6 LB: > { %s4460_s25 = sadd.s32 4294967295, %s4379_s24   ;;  %s3495_s26 = sadd.s32 4294967294, %s4379_s24   ;;  %s4379_s24 = sphi %s4445_s24, %s5225_s24   ;;  %s4375_s23 = sphi %s4443_s23, %s5224_s23   ;;  %s4371_s22 = sphi %s4441_s22, %s5223_s22   ;;  %s4367_s21 = sphi %s4439_s21, %s5222_s21  }
   0x7   : > { %p69_p0 = scmp.ne.s32.totalorder %s4371_s22, %s4367_s21  ;;  %p5206_p1 = scmp.eq.s32.totalorder %s4460_s25, 0 }
   0x8   : > { %p183_p3 = scmp.eq.s32.totalorder %s3495_s26, 1  ;;  %p3496_p5 = scmp.ge.s32.totalorder %s4379_s24, 1 }
   0x9   : > { %p4469_p4 = por %p5206_p1, %p69_p0  ;;  %p190_p7 = scmp.lt.s32.totalorder %s4379_s24, 3 }
   0xa   : > { %p4474_p6 = por %p183_p3, %p69_p0  ;;  %s4381_s30 = smov [#allocation5]  }
   0xb   : > { %s5209_s27 = scalar_select %p4469_p4, 1, 0 }
   0xc   : > { %s5210_s28 = scalar_select %p4474_p6, 1, 0 }
   0xd   : > { %p4479_p8 = pnand %p3496_p5, %p190_p7  ;;  %s205_s7 = sshll.u32 %s4381_s30, 4  ;;  %s4483_s7 = int_to_ptr.vmem [resolvable:$true] %s205_s7 }
   0xe   : > { %s4495_s9 = sadd.s32 1, %s4379_s24   ;;  %s56_s10 = sadd.s32 1, %s4375_s23 }
   0xf   : > { %s5211_s29 = scalar_select %p4479_p8, 1, 0 }
  0x10   : > { %p4050_p9 = pneg %p4479_p8  ;;  %s53_s11 = ssub.s32 %s4379_s24, %s4495_s9 }
  0x11   : > { %s4251_s14 = scalar_lea.hbm %s5202_s3, 256 }
  0x12   : > { %p4490_p11 = pnand %p4050_p9, %p5206_p1  ;;  %p4252_p12 = scmp.ne.s32.totalorder %s5202_s3, %s4251_s14 }
  0x13   : > { %p4258_p5 = scmp.lt.u32.totalorder %s4251_s14, %s5202_s3 }
  0x14   : > { %p4253_p13 = pneg %p4490_p11 }
  0x16   : > { %p4254_p0 = pnand %p4253_p13, %p4252_p12 }
  0x18   : > { %p4255_p3 = pneg %p4254_p0 }
  0x1a   : > { %p4260_p7 = pnand %p4258_p5, %p4255_p3 }
  0x1c   : > { %4263 = shalt.err (!%p4260_p7)
}
  0x1d   : > { %s4264_s19 = scalar_lea.vmem %s4483_s7, 256  ;;  %p4272_p2 = scmp.lt.s32.totalorder %s4483_s7, %s4483_s7 }
  0x1e   : > { %p4265_p9 = scmp.ne.s32.totalorder %s4483_s7, %s4264_s19  ;;  %p4273_p6 = scmp.lt.s32.totalorder %s4264_s19, %s4264_s19 }
  0x20   : > { %p4267_p10 = pnand %p4265_p9, %p4253_p13  ;;  %p4274_p4 = por %p4273_p6, %p4272_p2 }
  0x22   : > { %p4268_p1 = pneg %p4267_p10 }
  0x24   : > { %p4275_p8 = pnand %p4274_p4, %p4268_p1 }
  0x26   : > { %4278 = shalt.err (!%p4275_p8)
}
  0x27   : > { %s4382_s20 = smov 64   ;;  %s4383_s26 = smov 4  }
  0x28   : > { %4053 = dma.hbm_to_vmem [thread:$0]  (!%p4490_p11), %s5202_s3, 256, %s4483_s7, [#allocation6], %s4382_s20, %s4382_s20, %s4383_s26  }
  0x29   : > { %p54_p2 = scmp.eq.s32.totalorder %s53_s11, 0  ;;  %p63_p1 = scmp.ne.s32.totalorder %s4375_s23, %s4371_s22 }
  0x2a   : > { %p64_p4 = scmp.eq.s32.totalorder %s4379_s24, 0  ;;  %p4063_p6 = scmp.lt.s32.totalorder %s4379_s24, 2 }
  0x2b   : > { %s4526_s13 = scalar_select %p54_p2, %s4375_s23, %s56_s10  }
  0x2c   : > { %p65_p8 = por %p64_p4, %p63_p1  ;;  %p5213_p10 = scmp.eq.s32.totalorder %s4460_s25, 1 }
  0x2d   : > { %s233_s15 = sand.u32 1, %s4375_s23   ;;  %s3631_s16 = sshll.u32 %s4379_s24, 9 }
  0x2e   : > { %p4530_p12 = por %p5213_p10, %p63_p1  ;;  %s3499_s17 = sshll.u32 %s233_s15, 5 }
  0x2f   : > { %s4539_s19 = scalar_lea.hbm %s5200_s1, %s3631_s16  ;;  %s237_s7 = scalar_lea.vmem [#allocation2], %s3499_s17 }
  0x30   : > { %s244_s10 = sshll.u32 %s237_s7, 4  ;;  %p4541_p11 = pnand %p4063_p6, %p65_p8  ;;  %s4545_s10 = int_to_ptr.vmem [resolvable:$true] %s244_s10 }
  0x31   : > { %s4547_s20 = scalar_lea.sflag [#allocation3], %s233_s15  ;;  %s4279_s26 = scalar_lea.hbm %s4539_s19, 512 }
  0x32   : > { %p4280_p13 = scmp.ne.s32.totalorder %s4539_s19, %s4279_s26  ;;  %p4281_p0 = pneg %p4541_p11 }
  0x33   : > { %s4284_s16 = scalar_lea.hbm %s5200_s1, 1024  ;;  %p4285_p7 = scmp.lt.u32.totalorder %s4539_s19, %s5200_s1 }
  0x34   : > { %p4282_p3 = pnand %p4281_p0, %p4280_p13  ;;  %p4286_p9 = scmp.lt.u32.totalorder %s4284_s16, %s4279_s26 }
  0x35   : > { %p4288_p1 = scmp.lt.u32.totalorder %s4279_s26, %s4539_s19 }
  0x36   : > { %p4283_p5 = pneg %p4282_p3  ;;  %p4287_p2 = por %p4286_p9, %p4285_p7 }
  0x38   : > { %p4289_p4 = por %p4288_p1, %p4287_p2 }
  0x3a   : > { %p4290_p6 = pnand %p4289_p4, %p4283_p5 }
  0x3c   : > { %4293 = shalt.err (!%p4290_p6)
}
  0x3d   : > { %s4294_s15 = scalar_lea.vmem %s4545_s10, 512  ;;  %s4384_s18 = smov [#allocation2]  }
  0x3e   : > { %p4295_p8 = scmp.ne.s32.totalorder %s4545_s10, %s4294_s15  ;;  %s4299_s7 = sshll.u32 %s4384_s18, 4  ;;  %s4300_s7 = int_to_ptr.vmem [resolvable:$false] %s4299_s7 }
  0x3f   : > { %s4301_s30 = scalar_lea.vmem %s4300_s7, 1024  ;;  %p4302_p3 = scmp.lt.s32.totalorder %s4545_s10, %s4300_s7 }
  0x40   : > { %p4297_p10 = pnand %p4295_p8, %p4281_p0  ;;  %p4303_p7 = scmp.lt.s32.totalorder %s4301_s30, %s4294_s15 }
  0x42   : > { %p4298_p13 = pneg %p4297_p10  ;;  %p4304_p9 = por %p4303_p7, %p4302_p3 }
  0x44   : > { %p4305_p2 = pnand %p4304_p9, %p4298_p13 }
  0x46   : > { %4308 = shalt.err (!%p4305_p2)
}
  0x47   : > { %s4385_s26 = smov 128   ;;  %s4386_s12 = smov 8  }
  0x48   : > { %4057 = dma.hbm_to_vmem [thread:$0]  (!%p4541_p11), %s4539_s19, 512, %s4545_s10, %s4547_s20, %s4385_s26, %s4385_s26, %s4386_s12  }
  0x49   : > { %p5216_p0 = scmp.ne.s32.totalorder %s5211_s29, 0 }
  0x4a   : > { %s4578_s16 = sand.u32 (!%p5216_p0), 1, %s4371_s22   ;;  %p5217_p5 = scmp.ne.s32.totalorder (!%p5216_p0), %s5209_s27, 0 }
  0x4b   : > { %256 = sbr.rel (%p5216_p0) target bundleno = 5960 (0x1748), region = 44  ;;  %s3503_s17 = sshll.u32 (!%p5216_p0), %s4578_s16, 5 }
  0x4c   : > { %s259_s8 = scalar_lea.sflag (!%p5216_p0), [#allocation3], %s4578_s16  ;;  %s4584_s15 = scalar_lea.vmem (!%p5216_p0), [#allocation2], %s3503_s17 }
  0x52   : > { %4354 = dma.done.wait (%p5217_p5), %s259_s8, 512  }
  0x53   : > { %4356 = vsyncadd (%p5217_p5), %s259_s8, 4294966784  ;;  %p5218_p11 = scmp.eq.s32.totalorder %s4460_s25, 0 }
  0x55   : > { %4358 = dma.done.wait (%p5218_p11), [#allocation6], 256   ;;  %p5219_p1 = pmov %p5218_p11 }
  0x56   : > { %v4119_v0 = vld [vmem:[%s5201_s2 + $0x40] sm:$0xff]   ;;  %v4121_v2 = vld [vmem:[%s5201_s2 + $0x48] sm:$0xff]   ;;  %p300_p4 = scmp.lt.s32.totalorder %s4460_s25, 1  ;;  %v4123_v4 = vld [vmem:[%s5201_s2 + $0x50] sm:$0xff]   ;;  %vm497_vm0 = vcmask 261120   ;;  %s4387_s19 = smov 32  }
  0x57   : > { %4360 = vsyncadd (%p5219_p1), [#allocation6], 4294967040  ;;  %v4120_v1 = vld [vmem:[%s5201_s2] sm:$0xff]   ;;  %3633 = vmatprep.subr.bf16.mxu0 %v4119_v0  ;;  %v4122_v3 = vld [vmem:[%s5201_s2 + $0x8] sm:$0xff]   ;;  %vm4389_vm1 = vmmov 0   ;;  %s4390_s7 = smov 96  }
  0x58   : > { %3634 = vmatpush3.bf16.msra.mxu0 %v4120_v1  ;;  %v4124_v5 = vld [vmem:[%s5201_s2 + $0x10] sm:$0xff]   ;;  %s301_s29 = scalar_select %p300_p4, %s4460_s25, 1  ;;  %v4125_v6 = vld [vmem:[%s5201_s2 + $0x58] sm:$0xff]   ;;  %v4127_v8 = vld [vmem:[%s5201_s2 + $0x60] sm:$0xff]   ;;  %vm1036_vm2 = vcmask 64512   ;;  %vm1288_vm3 = vcmask 1043456  }
  0x59   : > { %3635 = vmatprep.subr.bf16.mxu0 %v4121_v2  ;;  %v4126_v7 = vld [vmem:[%s5201_s2 + $0x18] sm:$0xff]   ;;  %v4128_v9 = vld [vmem:[%s5201_s2 + $0x20] sm:$0xff]   ;;  %v4129_v11 = vld [vmem:[%s5201_s2 + $0x68] sm:$0xff]   ;;  %s4391_s12 = smov 64   ;;  %s4393_s8 = smov 120  }
  0x5a   : > { %s4041_s27 = smul.u32 48, %s301_s29  ;;  %v4134_v10 = vld [vmem:[%s5201_s2 + $0x80] sm:$0xff]   ;;  %v4130_v12 = vld [vmem:[%s5201_s2 + $0x28] sm:$0xff]   ;;  %v4131_v13 = vld [vmem:[%s5201_s2 + $0x70] sm:$0xff]   ;;  %s4395_s10 = smov 80  }
  0x5b   : > { %3761 = vmatprep.subr.bf16.mxu1 %v4134_v10  ;;  %v4139_v15 = vld [vmem:[%s5201_s2 + $0x88] sm:$0xff]   ;;  %v4132_v18 = vld [vmem:[%s5201_s2 + $0x30] sm:$0xff]   ;;  %v4133_v19 = vld [vmem:[%s5201_s2 + $0x78] sm:$0xff]   ;;  %s4396_s29 = smov 112   ;;  %s4398_s26 = smov 72  }
  0x5c   : > { %3636 = vmatpush3.bf16.msra.mxu0 %v4122_v3  ;;  %s4632_s11 = scalar_lea.vmem %s5199_s0, %s4041_s27  ;;  %3762 = vmatpush3.bf16.msra.mxu1 %v4134_v10  ;;  %v4135_v20 = vld [vmem:[%s5201_s2 + $0x38] sm:$0xff]   ;;  %v3507_v30 = vld [vmem:[%s5204_s5] ss:$0 sm:$0xff]  ;;  %v4146_v10 = vld [vmem:[%s5203_s4 + $0x8] sm:$0xff]   ;;  %s4399_s27 = smov 104  }
  0x5d   : > { %3637 = vmatprep.subr.bf16.mxu0 %v4123_v4  ;;  %v4138_v14 = vld [vmem:[%s4632_s11 + $0x4] ss:$12 sps:$4 sm:$0xff]   ;;  %v4140_v16 = vld [vmem:[%s4632_s11 + $0x8] ss:$12 sps:$4 sm:$0xff]   ;;  %3763 = vmatprep.subr.bf16.mxu1 %v4139_v15  ;;  %v4141_v17 = vld [vmem:[%s4632_s11 + $0x20] ss:$12 sps:$4 sm:$0xff]  }
  0x5e   : > { %536 = vmatprep.mubr.bf16.mxu0 %v4138_v14  ;;  %3765 = vmatprep.mubr.msk.bf16.mxu1 %vm497_vm0, %v4140_v16  ;;  %v4136_v21 = vld [vmem:[%s4632_s11] ss:$12 sps:$4 sm:$0xff]   ;;  %v4142_v22 = vld [vmem:[%s4632_s11 + $0x1c] ss:$12 sps:$4 sm:$0xff]   ;;  %v4144_v23 = vld [vmem:[%s4632_s11 + $0x18] ss:$12 sps:$4 sm:$0xff]  }
  0x5f   : > { %s4397_s11 = smov 48   ;;  %s4401_s18 = smov [#allocation7]  }
  0x60   : > { %3638 = vmatpush3.bf16.msra.mxu0 %v4124_v5  ;;  %3764 = vmatpush3.bf16.msra.mxu1 %v4139_v15 }
  0x61   : > { %3639 = vmatprep.subr.bf16.mxu0 %v4125_v6 }
  0x63   : > { %3766 = vmatmul.mubr.msk.bf16.vlgmr.msra.gmra.mrb[0].mxu1 %vm497_vm0, %v4141_v17 }
  0x64   : > { %3640 = vmatpush3.bf16.msra.mxu0 %v4126_v7 }
  0x65   : > { %3641 = vmatprep.subr.bf16.mxu0 %v4127_v8 }
  0x68   : > { %3642 = vmatpush3.bf16.msra.mxu0 %v4128_v9  ;;  %v4145_v9 = vld [vmem:[%s5203_s4] sm:$0xff]  }
  0x69   : > { %3643 = vmatprep.subr.bf16.mxu0 %v4129_v11  ;;  %3769 = vmatprep.subr.bf16.mxu1 %v4145_v9 }
  0x6a   : > { %3770 = vmatpush3.bf16.msra.mxu1 %v4145_v9  ;;  %v317_v9 = vld [vmem:[%s4584_s15 + $0x18] sm:$0xff] }
  0x6b   : > { %3771 = vmatprep.subr.bf16.mxu1 %v4146_v10 }
  0x6c   : > { %3644 = vmatpush3.bf16.msra.mxu0 %v4130_v12 }
  0x6d   : > { %3645 = vmatprep.subr.bf16.mxu0 %v4131_v13 }
  0x6e   : > { %3772 = vmatpush3.bf16.msra.mxu1 %v4146_v10 }
  0x70   : > { %3646 = vmatpush3.bf16.msra.mxu0 %v4132_v18 }
  0x71   : > { %3647 = vmatprep.subr.bf16.mxu0 %v4133_v19 }
  0x74   : > { %3648 = vmatpush3.bf16.msra.mxu0 %v4135_v20 }
  0x77   : > { %537 = vmatmul.mubr.bf16.vlgmr.msra.gmra.mrb[0].mxu0 %v4136_v21 }
  0x78   : > { %544 = vmatprep.mubr.bf16.mxu0 %v4142_v22 }
  0x7f   : > { %545 = vmatmul.mubr.bf16.gmra.mrb[4].mxu0 %v4144_v23 }
 0x136   : > { %v3767_v24 = vpop.f32.mrb[0].mxu1 }
 0x137   : > { %v587_v25 = vpop.f32.mrb[1].mxu1 }
 0x138   : > { %v3768_v26 = vpop.f32.mrb[2].mxu1 }
 0x139   : > { %v590_v27 = vpop.f32.mrb[3].mxu1 }
 0x14a   : > { %v3649_v28 = vpop.f32.mrb[0].mxu0 }
 0x14b   : > { %v3650_v29 = vpop.f32.mrb[1].mxu0 }
 0x14c   : > { %v3651_v31 = vadd.f32 %v3650_v29, %v3649_v28  ;;  %v3652_v32 = vpop.f32.mrb[2].mxu0  ;;  %v3535_v29 = vld [vmem:[%s5204_s5 + $0x2] ss:$0 sm:$0xff] }
 0x14d   : > { %v3653_v33 = vpop.f32.mrb[3].mxu0 }
 0x14e   : > { %v3654_v34 = vadd.f32 %v3653_v33, %v3652_v32  ;;  %v539_v35 = vadd.f32 %v3651_v31, %v3507_v30 }
 0x150   : > { %v588_v36 = vadd.f32 %v587_v25, %v539_v35  ;;  %v542_v37 = vadd.f32 %v3654_v34, %v3507_v30  ;;  %v3534_v25 = vld [vmem:[%s5204_s5 + $0x1] ss:$0 sm:$0xff] }
 0x152   : > { %v591_v38 = vadd.f32 %v590_v27, %v542_v37  ;;  %v3655_v39 = vpop.f32.mrb[4].mxu0  ;;  %v604_v40 = vsel %vm497_vm0, %v588_v36, 0.0 }
 0x153   : > { %v3656_v41 = vpop.f32.mrb[5].mxu0  ;;  %605 = vadd.xlane.f32.xlu0 %v604_v40 }
 0x154   : > { %v3657_v42 = vadd.f32 %v3656_v41, %v3655_v39  ;;  %v3658_v43 = vpop.f32.mrb[6].mxu0  ;;  %v607_v47 = vsel %vm497_vm0, %v591_v38, 0.0 }
 0x155   : > { %v3659_v44 = vpop.f32.mrb[7].mxu0 }
 0x156   : > { %v547_v45 = vadd.f32 %v3657_v42, %v3507_v30  ;;  %v3660_v46 = vadd.f32 %v3659_v44, %v3658_v43  ;;  %v4147_v43 = vld [vmem:[%s5203_s4 + $0x10] sm:$0xff]   ;;  %v4148_v44 = vld [vmem:[%s5203_s4 + $0x18] sm:$0xff]  }
 0x157   : > { %608 = vadd.xlane.f32.xlu0 %v607_v47  ;;  %3777 = vmatprep.subr.bf16.mxu1 %v4147_v43 }
 0x158   : > { %v550_v48 = vadd.f32 %v3660_v46, %v3507_v30  ;;  %v596_v49 = vadd.f32 %v3767_v24, %v547_v45  ;;  %v3536_v45 = vld [vmem:[%s5204_s5 + $0x3] ss:$0 sm:$0xff] }
 0x15a   : > { %v610_v50 = vsel %vm497_vm0, %v596_v49, 0.0  ;;  %v599_v51 = vadd.f32 %v3768_v26, %v550_v48 }
 0x15b   : > { %611 = vadd.xlane.f32.xlu1 %v610_v50 }
 0x15c   : > { %v613_v52 = vsel %vm497_vm0, %v599_v51, 0.0 }
 0x15f   : > { %614 = vadd.xlane.f32.xlu1 %v613_v52 }
 0x1e0   : > { %v606_v53 = vpop.xlane.xlu0 %605 }
 0x1e1   : > { %v617_v54 = vmul.f32 0.03125, %v606_v53 }
 0x1e3   : > { %v621_v55 = vsub.f32 %v588_v36, %v617_v54 }
 0x1e4   : > { %v609_v56 = vpop.xlane.xlu0 %608 }
 0x1e5   : > { %v618_v57 = vmul.f32 0.03125, %v609_v56  ;;  %v625_v58 = vmul.f32 %v621_v55, %v621_v55 }
 0x1e7   : > { %v622_v59 = vsub.f32 %v591_v38, %v618_v57  ;;  %v629_v60 = vsel %vm497_vm0, %v625_v58, 0.0 }
 0x1e8   : > { %v612_v61 = vpop.xlane.xlu1 %611  ;;  %630 = vadd.xlane.f32.xlu0 %v629_v60  ;;  %v3545_v60 = vld [vmem:[%s5204_s5 + $0x4] ss:$0 sm:$0xff] }
 0x1e9   : > { %v619_v62 = vmul.f32 0.03125, %v612_v61  ;;  %v626_v63 = vmul.f32 %v622_v59, %v622_v59 }
 0x1eb   : > { %v623_v0 = vsub.f32 %v596_v49, %v619_v62  ;;  %v632_v1 = vsel %vm497_vm0, %v626_v63, 0.0  ;;  %v314_v63 = vld [vmem:[%s4584_s15] sm:$0xff] }
 0x1ec   : > { %v615_v2 = vpop.xlane.xlu1 %614  ;;  %633 = vadd.xlane.f32.xlu1 %v632_v1 }
 0x1ed   : > { %v620_v3 = vmul.f32 0.03125, %v615_v2  ;;  %v627_v4 = vmul.f32 %v623_v0, %v623_v0 }
 0x1ef   : > { %v624_v5 = vsub.f32 %v599_v51, %v620_v3  ;;  %v635_v6 = vsel %vm497_vm0, %v627_v4, 0.0  ;;  %v315_v4 = vld [vmem:[%s4584_s15 + $0x8] sm:$0xff] }
 0x1f0   : > { %636 = vadd.xlane.f32.xlu0 %v635_v6 }
 0x1f1   : > { %v628_v7 = vmul.f32 %v624_v5, %v624_v5 }
 0x1f3   : > { %v638_v8 = vsel %vm497_vm0, %v628_v7, 0.0 }
 0x1f4   : > { %639 = vadd.xlane.f32.xlu1 %v638_v8 }
 0x275   : > { %v631_v11 = vpop.xlane.xlu0 %630 }
 0x276   : > { %v641_v12 = vmul.f32 0.03125, %v631_v11 }
 0x278   : > { %v645_v13 = vadd.f32 1e-05, %v641_v12 }
 0x279   : > { %v634_v14 = vpop.xlane.xlu1 %633 }
 0x27a   : > { %4155 = vrsqrt.f32 %v645_v13  ;;  %v642_v15 = vmul.f32 0.03125, %v634_v14 }
 0x27c   : > { %v646_v16 = vadd.f32 1e-05, %v642_v15 }
 0x27d   : > { %v637_v17 = vpop.xlane.xlu0 %636 }
 0x27e   : > { %4157 = vrsqrt.f32 %v646_v16  ;;  %v643_v18 = vmul.f32 0.03125, %v637_v17 }
 0x280   : > { %v647_v19 = vadd.f32 1e-05, %v643_v18 }
 0x281   : > { %v640_v20 = vpop.xlane.xlu1 %639 }
 0x282   : > { %4159 = vrsqrt.f32 %v647_v19  ;;  %v644_v21 = vmul.f32 0.03125, %v640_v20 }
 0x284   : > { %v4156_v22 = vpop.eup %4155  ;;  %v648_v23 = vadd.f32 1e-05, %v644_v21 }
 0x285   : > { %v653_v24 = vmul.f32 %v4156_v22, %v621_v55 }
 0x286   : > { %4161 = vrsqrt.f32 %v648_v23 }
 0x287   : > { %v661_v28 = vmul.f32 %v3534_v25, %v653_v24 }
 0x288   : > { %v4158_v26 = vpop.eup %4157 }
 0x289   : > { %v654_v27 = vmul.f32 %v4158_v26, %v622_v59  ;;  %v669_v33 = vadd.f32 %v3535_v29, %v661_v28 }
 0x28b   : > { %v662_v30 = vmul.f32 %v3534_v25, %v654_v27 }
 0x28c   : > { %v4160_v31 = vpop.eup %4159 }
 0x28d   : > { %v655_v32 = vmul.f32 %v4160_v31, %v623_v0  ;;  %v670_v34 = vadd.f32 %v3535_v29, %v662_v30 }
 0x28f   : > { %v677_v35 = vpack.c.bf16 %v670_v34, %v669_v33  ;;  %v663_v38 = vmul.f32 %v3534_v25, %v655_v32 }
 0x290   : > { %v4162_v36 = vpop.eup %4161 }
 0x291   : > { %v656_v37 = vmul.f32 %v4162_v36, %v624_v5  ;;  %3773 = vmatprep.mubr.msk.bf16.mxu1 %vm497_vm0, %v677_v35  ;;  %v671_v40 = vadd.f32 %v3535_v29, %v663_v38  ;;  %v316_v5 = vld [vmem:[%s4584_s15 + $0x10] sm:$0xff]  ;;  %v4150_v38 = vld [vmem:[#allocation5 + $0x8] sm:$0xff]   ;;  %s4392_s15 = smov 88  }
 0x293   : > { %v664_v39 = vmul.f32 %v3534_v25, %v656_v37  ;;  %v4149_v37 = vld [vmem:[#allocation5] sm:$0xff]  }
 0x295   : > { %v672_v41 = vadd.f32 %v3535_v29, %v664_v39  ;;  %v3557_v39 = vld [vmem:[%s5204_s5 + $0x8] ss:$0 sm:$0xff] }
 0x297   : > { %v678_v42 = vpack.c.bf16 %v672_v41, %v671_v40 }
 0x299   : > { %3774 = vmatmul.mubr.msk.bf16.vlgmr.msra.gmra.mrb[4].mxu1 %vm497_vm0, %v678_v42 }
 0x29a   : > { %3778 = vmatpush3.bf16.msra.mxu1 %v4147_v43 }
 0x29b   : > { %3779 = vmatprep.subr.bf16.mxu1 %v4148_v44 }
 0x29e   : > { %3780 = vmatpush3.bf16.msra.mxu1 %v4148_v44 }
 0x29f   : > { %3785 = vmatprep.subr.bf16.mxu1 %v4149_v37 }
 0x36c   : > { %v3775_v46 = vpop.f32.mrb[4].mxu1 }
 0x36d   : > { %v745_v47 = vadd.f32 %v3775_v46, %v3536_v45  ;;  %v736_v48 = vpop.f32.mrb[5].mxu1 }
 0x36e   : > { %v737_v49 = vadd.f32 %v3536_v45, %v736_v48  ;;  %v3776_v50 = vpop.f32.mrb[6].mxu1 }
 0x36f   : > { %v748_v51 = vadd.f32 %v3776_v50, %v3536_v45  ;;  %v739_v52 = vpop.f32.mrb[7].mxu1  ;;  %v753_v54 = vmax.f32 %v745_v47, 0.0 }
 0x370   : > { %v740_v53 = vadd.f32 %v3536_v45, %v739_v52  ;;  %v751_v56 = vmax.f32 %v737_v49, 0.0 }
 0x371   : > { %v754_v55 = vmax.f32 %v748_v51, 0.0 }
 0x372   : > { %v752_v57 = vmax.f32 %v740_v53, 0.0  ;;  %v3550_v53 = vld [vmem:[%s5204_s5 + $0x5] ss:$0 sm:$0xff] }
 0x373   : > { %v761_v58 = vpack.c.bf16 %v754_v55, %v753_v54 }
 0x374   : > { %v760_v59 = vpack.c.bf16 %v752_v57, %v751_v56 }
 0x376   : > { %3781 = vmatprep.mubr.msk.bf16.mxu1 %vm497_vm0, %v760_v59  ;;  %v3551_v59 = vld [vmem:[%s5204_s5 + $0x6] ss:$0 sm:$0xff] }
 0x377   : > { %3782 = vmatmul.mubr.msk.bf16.vlgmr.msra.gmra.mrb[8].mxu1 %vm497_vm0, %v761_v58 }
 0x378   : > { %3786 = vmatpush3.bf16.msra.mxu1 %v4149_v37 }
 0x379   : > { %3787 = vmatprep.subr.bf16.mxu1 %v4150_v38 }
 0x37c   : > { %3788 = vmatpush3.bf16.msra.mxu1 %v4150_v38 }
 0x44a   : > { %v3783_v61 = vpop.f32.mrb[8].mxu1 }
 0x44b   : > { %v819_v62 = vpop.f32.mrb[9].mxu1  ;;  %v828_v0 = vadd.f32 %v3783_v61, %v3545_v60 }
 0x44c   : > { %v820_v1 = vadd.f32 %v3545_v60, %v819_v62  ;;  %v3784_v2 = vpop.f32.mrb[10].mxu1 }
 0x44d   : > { %v822_v3 = vpop.f32.mrb[11].mxu1  ;;  %v831_v6 = vadd.f32 %v3784_v2, %v3545_v60  ;;  %v836_v12 = vadd.f32 %v828_v0, %v316_v5 }
 0x44e   : > { %v823_v7 = vadd.f32 %v3545_v60, %v822_v3  ;;  %v834_v8 = vadd.f32 %v820_v1, %v314_v63 }
 0x44f   : > { %v837_v14 = vadd.f32 %v831_v6, %v317_v9  ;;  %v846_v15 = vsel %vm497_vm0, %v836_v12, 0.0 }
 0x450   : > { %v840_v10 = vsel %vm497_vm0, %v834_v8, 0.0  ;;  %v835_v11 = vadd.f32 %v823_v7, %v315_v4 }
 0x451   : > { %841 = vadd.xlane.f32.xlu0 %v840_v10  ;;  %v849_v16 = vsel %vm497_vm0, %v837_v14, 0.0 }
 0x452   : > { %v843_v13 = vsel %vm497_vm0, %v835_v11, 0.0 }
 0x453   : > { %844 = vadd.xlane.f32.xlu1 %v843_v13 }
 0x455   : > { %847 = vadd.xlane.f32.xlu0 %v846_v15 }
 0x457   : > { %850 = vadd.xlane.f32.xlu1 %v849_v16 }
 0x4de   : > { %v842_v17 = vpop.xlane.xlu0 %841 }
 0x4df   : > { %v852_v18 = vmul.f32 0.03125, %v842_v17 }
 0x4e0   : > { %v845_v19 = vpop.xlane.xlu1 %844 }
 0x4e1   : > { %v856_v20 = vsub.f32 %v834_v8, %v852_v18  ;;  %v853_v21 = vmul.f32 0.03125, %v845_v19  ;;  %v4388_v8 = vmov 0.0  }
 0x4e2   : > { %v848_v22 = vpop.xlane.xlu0 %847  ;;  %3793 = vmatprep.subr.bf16.mxu1 %v4388_v8  ;;  %3799 = vmatprep.subr.bf16.mxu0 %v4388_v8 }
 0x4e3   : > { %v857_v23 = vsub.f32 %v835_v11, %v853_v21  ;;  %v854_v24 = vmul.f32 0.03125, %v848_v22  ;;  %v860_v25 = vmul.f32 %v856_v20, %v856_v20  ;;  %3801 = vmatprep.mubr.msk.bf16.mxu0 %vm4389_vm1, %v4388_v8  ;;  %v3556_v22 = vld [vmem:[%s5204_s5 + $0x7] ss:$0 sm:$0xff] }
 0x4e4   : > { %v851_v26 = vpop.xlane.xlu1 %850 }
 0x4e5   : > { %v858_v27 = vsub.f32 %v836_v12, %v854_v24  ;;  %v855_v28 = vmul.f32 0.03125, %v851_v26  ;;  %v864_v29 = vsel %vm497_vm0, %v860_v25, 0.0  ;;  %v861_v30 = vmul.f32 %v857_v23, %v857_v23 }
 0x4e6   : > { %865 = vadd.xlane.f32.xlu0 %v864_v29 }
 0x4e7   : > { %v859_v31 = vsub.f32 %v837_v14, %v855_v28  ;;  %v867_v32 = vsel %vm497_vm0, %v861_v30, 0.0  ;;  %v862_v33 = vmul.f32 %v858_v27, %v858_v27 }
 0x4e8   : > { %868 = vadd.xlane.f32.xlu1 %v867_v32 }
 0x4e9   : > { %v870_v34 = vsel %vm497_vm0, %v862_v33, 0.0  ;;  %v863_v35 = vmul.f32 %v859_v31, %v859_v31 }
 0x4ea   : > { %871 = vadd.xlane.f32.xlu0 %v870_v34 }
 0x4eb   : > { %v873_v36 = vsel %vm497_vm0, %v863_v35, 0.0 }
 0x4ec   : > { %874 = vadd.xlane.f32.xlu1 %v873_v36 }
 0x500   : > { %996 = vrot.lane.b32.xlu0 %v3557_v39, %s4387_s19  ;;  %s4394_s19 = smov 56  }
 0x573   : > { %v866_v40 = vpop.xlane.xlu0 %865 }
 0x574   : > { %v876_v41 = vmul.f32 0.03125, %v866_v40 }
 0x575   : > { %v869_v42 = vpop.xlane.xlu1 %868 }
 0x576   : > { %v880_v43 = vadd.f32 1e-05, %v876_v41  ;;  %v877_v44 = vmul.f32 0.03125, %v869_v42 }
 0x577   : > { %v872_v45 = vpop.xlane.xlu0 %871 }
 0x578   : > { %4163 = vrsqrt.f32 %v880_v43  ;;  %v881_v46 = vadd.f32 1e-05, %v877_v44  ;;  %v878_v47 = vmul.f32 0.03125, %v872_v45 }
 0x579   : > { %v875_v48 = vpop.xlane.xlu1 %874 }
 0x57a   : > { %4165 = vrsqrt.f32 %v881_v46  ;;  %v882_v49 = vadd.f32 1e-05, %v878_v47  ;;  %v879_v50 = vmul.f32 0.03125, %v875_v48 }
 0x57b   : > { %v997_v9 = vpop.permute.xlu0 %996 }
 0x57c   : > { %4167 = vrsqrt.f32 %v882_v49  ;;  %v883_v51 = vadd.f32 1e-05, %v879_v50 }
 0x57e   : > { %4169 = vrsqrt.f32 %v883_v51 }
 0x582   : > { %v4164_v52 = vpop.eup %4163 }
 0x583   : > { %v888_v54 = vmul.f32 %v4164_v52, %v856_v20 }
 0x584   : > { %v4166_v55 = vpop.eup %4165 }
 0x585   : > { %v889_v56 = vmul.f32 %v4166_v55, %v857_v23  ;;  %v896_v57 = vmul.f32 %v3550_v53, %v888_v54 }
 0x586   : > { %v4168_v58 = vpop.eup %4167 }
 0x587   : > { %v890_v60 = vmul.f32 %v4168_v58, %v858_v27  ;;  %v897_v61 = vmul.f32 %v3550_v53, %v889_v56  ;;  %v4723_v1 = vadd.f32 %v3551_v59, %v896_v57 }
 0x588   : > { %v4170_v62 = vpop.eup %4169 }
 0x589   : > { %v898_v63 = vmul.f32 %v3550_v53, %v890_v60  ;;  %v891_v0 = vmul.f32 %v4170_v62, %v859_v31  ;;  %v4725_v2 = vadd.f32 %v3551_v59, %v897_v61 }
 0x58b   : > { %v899_v3 = vmul.f32 %v3550_v53, %v891_v0  ;;  %v912_v4 = vpack.c.bf16 %v4725_v2, %v4723_v1  ;;  %v4730_v5 = vadd.f32 %v3551_v59, %v898_v63  ;;  %v3558_v63 = vld [vmem:[%s5204_s5 + $0x9] ss:$0 sm:$0xff] }
 0x58d   : > { %3789 = vmatprep.mubr.msk.bf16.mxu1 %vm497_vm0, %v912_v4  ;;  %v4732_v6 = vadd.f32 %v3551_v59, %v899_v3 }
 0x58f   : > { %v913_v7 = vpack.c.bf16 %v4732_v6, %v4730_v5 }
 0x591   : > { %3790 = vmatmul.mubr.msk.bf16.vlgmr.msra.gmra.mrb[12].mxu1 %vm497_vm0, %v913_v7 }
 0x592   : > { %3795 = vmatprep.mubr.msk.bf16.mxu1 %vm4389_vm1, %v4388_v8 }
 0x664   : > { %v4743_v10 = vpop.f32.mrb[12].mxu1 }
 0x665   : > { %v4745_v11 = vpop.f32.mrb[13].mxu1  ;;  %v1001_v19 = vadd.f32 %v4743_v10, %v997_v9  ;;  %v988_v33 = vadd.f32 %v4743_v10, %v3556_v22 }
 0x666   : > { %v999_v12 = vadd.f32 %v997_v9, %v4745_v11  ;;  %v4748_v13 = vpop.f32.mrb[14].mxu1  ;;  %v986_v25 = vadd.f32 %v3556_v22, %v4745_v11 }
 0x667   : > { %v1002_v14 = vadd.f32 %v4748_v13, %v997_v9  ;;  %v4751_v15 = vpop.f32.mrb[15].mxu1  ;;  %v4764_v21 = vpack.c.bf16 %v1001_v19, %v1001_v19  ;;  %v4792_v36 = vpack.c.bf16 %v988_v33, %v988_v33  ;;  %v989_v37 = vadd.f32 %v4748_v13, %v3556_v22 }
 0x668   : > { %v4753_v16 = vpack.c.bf16 %v999_v12, %v999_v12  ;;  %v1000_v17 = vadd.f32 %v997_v9, %v4751_v15  ;;  %v4774_v28 = vpack.c.bf16 %v986_v25, %v986_v25  ;;  %v987_v29 = vadd.f32 %v3556_v22, %v4751_v15 }
 0x669   : > { %v4756_v18 = vpack.c.bf16 %v1002_v14, %v1002_v14  ;;  %v4800_v38 = vpack.c.bf16 %v989_v37, %v989_v37 }
 0x66a   : > { %1034 = vrot.lane.b32.xlu1 %v4753_v16, %s4390_s7  ;;  %v4761_v20 = vpack.c.bf16 %v1000_v17, %v1000_v17  ;;  %v4784_v34 = vpack.c.bf16 %v987_v29, %v987_v29 }
 0x66b   : > { %1182 = vrot.lane.b32.xlu0 %v4756_v18, %s4390_s7 }
 0x66e   : > { %1084 = vrot.lane.b32.xlu1 %v4761_v20, %s4390_s7 }
 0x672   : > { %1133 = vrot.lane.b32.xlu1 %v4764_v21, %s4390_s7  ;;  %s4313_s7 = sshll.u32 %s4401_s18, 4  ;;  %s4314_s7 = int_to_ptr.vmem [resolvable:$false] %s4313_s7 }
 0x673   : > { %s4315_s30 = scalar_lea.vmem %s4314_s7, 1024 }
 0x6dc   : > { %v1035_v23 = vpop.permute.xlu1 %1034 }
 0x6dd   : > { %v1041_v24 = vsel %vm1036_vm2, %v1035_v23, 0  ;;  %v1183_v32 = vpop.permute.xlu0 %1182 }
 0x6de   : > { %3794 = vmatpush3.bf16.xpose.msra.mxu1 %v1041_v24  ;;  %v1188_v35 = vsel %vm1036_vm2, %v1183_v32, 0 }
 0x6df   : > { %3805 = vmatprep.subr.bf16.mxu1 %v4388_v8 }
 0x6e0   : > { %v1085_v26 = vpop.permute.xlu1 %1084 }
 0x6e1   : > { %v1090_v27 = vsel %vm1036_vm2, %v1085_v26, 0 }
 0x6e2   : > { %3800 = vmatpush3.bf16.xpose.msra.mxu0 %v1090_v27 }
 0x6e3   : > { %3811 = vmatprep.subr.bf16.mxu0 %v4388_v8 }
 0x6e4   : > { %v1134_v30 = vpop.permute.xlu1 %1133 }
 0x6e5   : > { %v1139_v31 = vsel %vm1036_vm2, %v1134_v30, 0  ;;  %3796 = vmatmul.mubr.msk.bf16.vlgmr.msra.gmra.mrb[16].mxu1 %vm1036_vm2, %v4774_v28 }
 0x6e6   : > { %3806 = vmatpush3.bf16.xpose.msra.mxu1 %v1139_v31  ;;  %3807 = vmatprep.mubr.msk.bf16.mxu1 %vm4389_vm1, %v4388_v8 }
 0x6e7   : > { %3817 = vmatprep.subr.bf16.mxu1 %v4388_v8 }
 0x6e9   : > { %3802 = vmatmul.mubr.msk.bf16.vlgmr.msra.gmra.mrb[8].mxu0 %vm1036_vm2, %v4784_v34 }
 0x6ea   : > { %3812 = vmatpush3.bf16.xpose.msra.mxu0 %v1188_v35  ;;  %3813 = vmatprep.mubr.msk.bf16.mxu0 %vm4389_vm1, %v4388_v8 }
 0x6eb   : > { %3823 = vmatprep.subr.bf16.mxu0 %v4388_v8 }
 0x6ed   : > { %3808 = vmatmul.mubr.msk.bf16.vlgmr.msra.gmra.mrb[20].mxu1 %vm1036_vm2, %v4792_v36 }
 0x6ee   : > { %3819 = vmatprep.mubr.msk.bf16.mxu1 %vm4389_vm1, %v4388_v8 }
 0x6f1   : > { %3814 = vmatmul.mubr.msk.bf16.vlgmr.msra.gmra.mrb[12].mxu0 %vm1036_vm2, %v4800_v38 }
 0x6f2   : > { %3825 = vmatprep.mubr.msk.bf16.mxu0 %vm4389_vm1, %v4388_v8 }
 0x7b8   : > { %v1077_v39 = vpop.f32.mrb[16].mxu1 }
 0x7b9   : > { %v1230_v40 = vmul.f32 0.35355338, %v1077_v39  ;;  %v3797_v41 = vpop.f32.mrb[17].mxu1 }
 0x7ba   : > { %v1080_v42 = vpop.f32.mrb[18].mxu1 }
 0x7bb   : > { %v3798_v43 = vpop.f32.mrb[19].mxu1  ;;  %v1234_v44 = vsel %vm1036_vm2, %v1230_v40, -inf }
 0x7bc   : > { %1235 = vmax.xlane.f32.xlu1 %v1234_v44  ;;  %v1126_v45 = vpop.f32.mrb[8].mxu0 }
 0x7bd   : > { %v1231_v46 = vmul.f32 0.35355338, %v1126_v45  ;;  %v3803_v47 = vpop.f32.mrb[9].mxu0 }
 0x7be   : > { %v1129_v48 = vpop.f32.mrb[10].mxu0 }
 0x7bf   : > { %v3804_v49 = vpop.f32.mrb[11].mxu0  ;;  %v1237_v50 = vsel %vm1036_vm2, %v1231_v46, -inf }
 0x7c0   : > { %1238 = vmax.xlane.f32.xlu0 %v1237_v50  ;;  %v1175_v51 = vpop.f32.mrb[20].mxu1 }
 0x7c1   : > { %v1232_v52 = vmul.f32 0.35355338, %v1175_v51  ;;  %v3809_v53 = vpop.f32.mrb[21].mxu1 }
 0x7c2   : > { %v1178_v54 = vpop.f32.mrb[22].mxu1 }
 0x7c3   : > { %v3810_v55 = vpop.f32.mrb[23].mxu1  ;;  %v1240_v56 = vsel %vm1036_vm2, %v1232_v52, -inf }
 0x7c4   : > { %v1224_v57 = vpop.f32.mrb[12].mxu0  ;;  %1241 = vmax.xlane.f32.xlu0 %v1240_v56 }
 0x7c5   : > { %v1233_v58 = vmul.f32 0.35355338, %v1224_v57  ;;  %v3815_v59 = vpop.f32.mrb[13].mxu0 }
 0x7c6   : > { %v1227_v60 = vpop.f32.mrb[14].mxu0 }
 0x7c7   : > { %v3816_v61 = vpop.f32.mrb[15].mxu0  ;;  %v1243_v62 = vsel %vm1036_vm2, %v1233_v58, -inf }
 0x7c8   : > { %1244 = vmax.xlane.f32.xlu0 %v1243_v62 }
 0x7cd   : > { %1009 = vrot.lane.b32.xlu1 %v3558_v63, %s4391_s12 }
 0x849   : > { %v1236_v0 = vpop.xlane.xlu1 %1235 }
 0x84a   : > { %v1246_v3 = vsub.f32 %v1230_v40, %v1236_v0 }
 0x84c   : > { %v1250_v4 = vmul.f32 1.442695, %v1246_v3 }
 0x84d   : > { %v1239_v7 = vpop.xlane.xlu0 %1238  ;;  %v1010_v9 = vpop.permute.xlu1 %1009 }
 0x84e   : > { %4171 = vpow2.f32 %v1250_v4  ;;  %v1247_v12 = vsub.f32 %v1231_v46, %v1239_v7  ;;  %v1012_v14 = vadd.f32 %v1010_v9, %v4745_v11  ;;  %v1014_v19 = vadd.f32 %v4743_v10, %v1010_v9 }
 0x84f   : > { %v1015_v25 = vadd.f32 %v4748_v13, %v1010_v9  ;;  %v1013_v41 = vadd.f32 %v1010_v9, %v4751_v15 }
 0x850   : > { %v1252_v17 = vmul.f32 1.442695, %v1247_v12  ;;  %v4816_v22 = vpack.c.bf16 %v1012_v14, %v1012_v14  ;;  %v4821_v26 = vpack.c.bf16 %v1014_v19, %v1014_v19 }
 0x851   : > { %v1242_v23 = vpop.xlane.xlu0 %1241  ;;  %v4825_v11 = vpack.c.bf16 %v1015_v25, %v1015_v25  ;;  %v4840_v42 = vpack.c.bf16 %v1013_v41, %v1013_v41 }
 0x852   : > { %4173 = vpow2.f32 %v1252_v17  ;;  %v1248_v24 = vsub.f32 %v1232_v52, %v1242_v23  ;;  %1283 = vrot.lane.b32.xlu1 %v4816_v22, %s4391_s12 }
 0x854   : > { %v1254_v27 = vmul.f32 1.442695, %v1248_v24 }
 0x855   : > { %v1245_v29 = vpop.xlane.xlu0 %1244 }
 0x856   : > { %4175 = vpow2.f32 %v1254_v27  ;;  %v1249_v30 = vsub.f32 %v1233_v58, %v1245_v29  ;;  %1382 = vrot.lane.b32.xlu1 %v4821_v26, %s4391_s12 }
 0x858   : > { %v4172_v10 = vpop.eup %4171  ;;  %v1256_v31 = vmul.f32 1.442695, %v1249_v30 }
 0x859   : > { %v1258_v32 = vsel %vm1036_vm2, %v4172_v10, 0.0 }
 0x85a   : > { %4177 = vpow2.f32 %v1256_v31  ;;  %1259 = vadd.xlane.f32.xlu0 %v1258_v32  ;;  %1431 = vrot.lane.b32.xlu1 %v4825_v11, %s4391_s12 }
 0x85c   : > { %v4174_v13 = vpop.eup %4173 }
 0x85d   : > { %v1261_v33 = vsel %vm1036_vm2, %v4174_v13, 0.0 }
 0x85e   : > { %1262 = vadd.xlane.f32.xlu0 %v1261_v33  ;;  %1484 = vrot.lane.b32.xlu1 %v4753_v16, %s4392_s15 }
 0x860   : > { %v4176_v35 = vpop.eup %4175 }
 0x861   : > { %v1264_v37 = vsel %vm1036_vm2, %v4176_v35, 0.0 }
 0x862   : > { %1265 = vadd.xlane.f32.xlu0 %v1264_v37  ;;  %1535 = vrot.lane.b32.xlu1 %v4761_v20, %s4392_s15 }
 0x864   : > { %v4178_v39 = vpop.eup %4177 }
 0x865   : > { %v1267_v40 = vsel %vm1036_vm2, %v4178_v39, 0.0 }
 0x866   : > { %1268 = vadd.xlane.f32.xlu0 %v1267_v40  ;;  %1482 = vrot.lane.b32.xlu1 %v4774_v28, %s4393_s8 }
 0x86a   : > { %1533 = vrot.lane.b32.xlu1 %v4784_v34, %s4393_s8 }
 0x86e   : > { %1637 = vrot.lane.b32.xlu1 %v4756_v18, %s4392_s15 }
 0x872   : > { %1635 = vrot.lane.b32.xlu1 %v4800_v38, %s4393_s8 }
 0x87c   : > { %1333 = vrot.lane.b32.xlu0 %v4840_v42, %s4391_s12 }
 0x880   : > { %1586 = vrot.lane.b32.xlu0 %v4764_v21, %s4392_s15  ;;  %s299_s15 = scalar_lea.vmem [#allocation7], %s3503_s17 }
 0x884   : > { %1584 = vrot.lane.b32.xlu0 %v4792_v36, %s4393_s8  ;;  %s4400_s8 = smov 40  }
 0x8c4   : > { %v1284_v43 = vpop.permute.xlu1 %1283 }
 0x8c5   : > { %v1290_v44 = vsel %vm1288_vm3, %v1284_v43, 0 }
 0x8c6   : > { %3818 = vmatpush3.bf16.msra.mxu1 %v1290_v44 }
 0x8c7   : > { %3829 = vmatprep.subr.bf16.mxu1 %v4388_v8 }
 0x8c8   : > { %v1383_v45 = vpop.permute.xlu1 %1382 }
 0x8c9   : > { %v1388_v55 = vsel %vm1288_vm3, %v1383_v45, 0 }
 0x8cc   : > { %v1432_v47 = vpop.permute.xlu1 %1431 }
 0x8cd   : > { %v1437_v63 = vsel %vm1288_vm3, %v1432_v47, 0 }
 0x8d0   : > { %v1485_v50 = vpop.permute.xlu1 %1484 }
 0x8d1   : > { %v1490_v9 = vsel %vm1036_vm2, %v1485_v50, 0 }
 0x8d4   : > { %v1536_v58 = vpop.permute.xlu1 %1535 }
 0x8d5   : > { %v1541_v17 = vsel %vm1036_vm2, %v1536_v58, 0 }
 0x8d8   : > { %v1483_v4 = vpop.permute.xlu1 %1482 }
 0x8dc   : > { %v1534_v14 = vpop.permute.xlu1 %1533 }
 0x8e0   : > { %v1638_v24 = vpop.permute.xlu1 %1637 }
 0x8e1   : > { %v1643_v25 = vsel %vm1036_vm2, %v1638_v24, 0 }
 0x8e4   : > { %v1636_v29 = vpop.permute.xlu1 %1635 }
 0x8e7   : > { %v1260_v46 = vpop.xlane.xlu0 %1259 }
 0x8e8   : > { %4179 = vrcp.f32 %v1260_v46 }
 0x8eb   : > { %v1263_v15 = vpop.xlane.xlu0 %1262 }
 0x8ec   : > { %4181 = vrcp.f32 %v1263_v15 }
 0x8ef   : > { %v1266_v48 = vpop.xlane.xlu0 %1265 }
 0x8f0   : > { %4183 = vrcp.f32 %v1266_v48 }
 0x8f2   : > { %v4180_v49 = vpop.eup %4179 }
 0x8f3   : > { %v1274_v51 = vmul.f32 %v4180_v49, %v4172_v10  ;;  %v1269_v52 = vpop.xlane.xlu0 %1268 }
 0x8f4   : > { %4185 = vrcp.f32 %v1269_v52 }
 0x8f5   : > { %v1278_v53 = vpack.c.bf16 %v1274_v51, %v1274_v51 }
 0x8f6   : > { %v4182_v54 = vpop.eup %4181 }
 0x8f7   : > { %v1275_v56 = vmul.f32 %v4182_v54, %v4174_v13  ;;  %v1334_v57 = vpop.permute.xlu0 %1333  ;;  %3820 = vmatmul.mubr.msk.bf16.vlgmr.msra.gmra.mrb[24].mxu1 %vm1036_vm2, %v1278_v53 }
 0x8f8   : > { %v1339_v59 = vsel %vm1288_vm3, %v1334_v57, 0  ;;  %3830 = vmatpush3.bf16.msra.mxu1 %v1388_v55  ;;  %3831 = vmatprep.mubr.msk.bf16.mxu1 %vm4389_vm1, %v4388_v8 }
 0x8f9   : > { %3824 = vmatpush3.bf16.msra.mxu0 %v1339_v59  ;;  %v1279_v60 = vpack.c.bf16 %v1275_v56, %v1275_v56  ;;  %3841 = vmatprep.subr.bf16.mxu1 %v4388_v8 }
 0x8fa   : > { %v4184_v61 = vpop.eup %4183  ;;  %3835 = vmatprep.subr.bf16.mxu0 %v4388_v8 }
 0x8fb   : > { %v1276_v62 = vmul.f32 %v4184_v61, %v4176_v35  ;;  %v1587_v19 = vpop.permute.xlu0 %1586 }
 0x8fc   : > { %3826 = vmatmul.mubr.msk.bf16.vlgmr.msra.gmra.mrb[16].mxu0 %vm1036_vm2, %v1279_v60  ;;  %v1592_v23 = vsel %vm1036_vm2, %v1587_v19, 0 }
 0x8fd   : > { %3836 = vmatpush3.bf16.msra.mxu0 %v1437_v63  ;;  %v1280_v0 = vpack.c.bf16 %v1276_v62, %v1276_v62  ;;  %3837 = vmatprep.mubr.msk.bf16.mxu0 %vm4389_vm1, %v4388_v8 }
 0x8fe   : > { %v4186_v3 = vpop.eup %4185  ;;  %3847 = vmatprep.subr.bf16.mxu0 %v4388_v8 }
 0x8ff   : > { %v1277_v7 = vmul.f32 %v4186_v3, %v4178_v39  ;;  %3832 = vmatmul.mubr.msk.bf16.vlgmr.msra.gmra.mrb[28].mxu1 %vm1036_vm2, %v1280_v0  ;;  %v1585_v27 = vpop.permute.xlu0 %1584 }
 0x900   : > { %3843 = vmatprep.mubr.msk.bf16.mxu1 %vm4389_vm1, %v4388_v8 }
 0x901   : > { %3842 = vmatpush3.bf16.xpose.msra.mxu1 %v1490_v9  ;;  %v1281_v12 = vpack.c.bf16 %v1277_v7, %v1277_v7 }
 0x902   : > { %3853 = vmatprep.subr.bf16.mxu1 %v4388_v8 }
 0x904   : > { %3838 = vmatmul.mubr.msk.bf16.vlgmr.msra.gmra.mrb[20].mxu0 %vm1036_vm2, %v1281_v12 }
 0x905   : > { %3849 = vmatprep.mubr.msk.bf16.mxu0 %vm4389_vm1, %v4388_v8 }
 0x906   : > { %3848 = vmatpush3.bf16.xpose.msra.mxu0 %v1541_v17 }
 0x907   : > { %3859 = vmatprep.subr.bf16.mxu0 %v4388_v8 }
 0x908   : > { %3844 = vmatmul.mubr.msk.bf16.vlgmr.msra.gmra.mrb[32].mxu1 %vm1036_vm2, %v1483_v4 }
 0x909   : > { %3854 = vmatpush3.bf16.xpose.msra.mxu1 %v1592_v23  ;;  %3855 = vmatprep.mubr.msk.bf16.mxu1 %vm4389_vm1, %v4388_v8 }
 0x90a   : > { %3865 = vmatprep.subr.bf16.mxu1 %v4388_v8 }
 0x90d   : > { %3850 = vmatmul.mubr.msk.bf16.vlgmr.msra.gmra.mrb[24].mxu0 %vm1036_vm2, %v1534_v14 }
 0x90e   : > { %3860 = vmatpush3.bf16.xpose.msra.mxu0 %v1643_v25  ;;  %3861 = vmatprep.mubr.msk.bf16.mxu0 %vm4389_vm1, %v4388_v8 }
 0x90f   : > { %3871 = vmatprep.subr.bf16.mxu0 %v4388_v8 }
 0x910   : > { %3856 = vmatmul.mubr.msk.bf16.vlgmr.msra.gmra.mrb[36].mxu1 %vm1036_vm2, %v1585_v27 }
 0x911   : > { %3867 = vmatprep.mubr.msk.bf16.mxu1 %vm4389_vm1, %v4388_v8 }
 0x915   : > { %3862 = vmatmul.mubr.msk.bf16.vlgmr.msra.gmra.mrb[28].mxu0 %vm1036_vm2, %v1636_v29 }
 0x916   : > { %3873 = vmatprep.mubr.msk.bf16.mxu0 %vm4389_vm1, %v4388_v8 }
 0x9ca   : > { %v4886_v30 = vpop.f32.mrb[24].mxu1 }
 0x9cb   : > { %v3821_v10 = vpop.f32.mrb[25].mxu1 }
 0x9cc   : > { %v1329_v31 = vpop.f32.mrb[26].mxu1 }
 0x9cd   : > { %v3822_v32 = vpop.f32.mrb[27].mxu1 }
 0x9cf   : > { %v4888_v13 = vpop.f32.mrb[16].mxu0 }
 0x9d0   : > { %v1479_v33 = vpack.c.bf16 %v4888_v13, %v4886_v30  ;;  %v3827_v35 = vpop.f32.mrb[17].mxu0 }
 0x9d1   : > { %v1378_v37 = vpop.f32.mrb[18].mxu0 }
 0x9d2   : > { %v3828_v39 = vpop.f32.mrb[19].mxu0  ;;  %v4892_v40 = vpop.f32.mrb[28].mxu1 }
 0x9d3   : > { %v3833_v41 = vpop.f32.mrb[29].mxu1 }
 0x9d4   : > { %v1427_v43 = vpop.f32.mrb[30].mxu1 }
 0x9d5   : > { %v3834_v44 = vpop.f32.mrb[31].mxu1 }
 0x9d7   : > { %v4894_v45 = vpop.f32.mrb[20].mxu0 }
 0x9d8   : > { %v1480_v46 = vpack.c.bf16 %v4894_v45, %v4892_v40  ;;  %v3839_v15 = vpop.f32.mrb[21].mxu0 }
 0x9d9   : > { %v1476_v47 = vpop.f32.mrb[22].mxu0 }
 0x9da   : > { %v3840_v48 = vpop.f32.mrb[23].mxu0 }
 0x9db   : > { %v1526_v49 = vpop.f32.mrb[32].mxu1 }
 0x9dc   : > { %v1685_v50 = vmul.f32 0.35355338, %v1526_v49  ;;  %v3845_v51 = vpop.f32.mrb[33].mxu1 }
 0x9dd   : > { %v1529_v52 = vpop.f32.mrb[34].mxu1 }
 0x9de   : > { %v3846_v53 = vpop.f32.mrb[35].mxu1  ;;  %v1689_v54 = vsel %vm1036_vm2, %v1685_v50, -inf }
 0x9df   : > { %1690 = vmax.xlane.f32.xlu0 %v1689_v54 }
 0x9e0   : > { %v1577_v55 = vpop.f32.mrb[24].mxu0 }
 0x9e1   : > { %v1686_v56 = vmul.f32 0.35355338, %v1577_v55  ;;  %v3851_v57 = vpop.f32.mrb[25].mxu0 }
 0x9e2   : > { %v1580_v58 = vpop.f32.mrb[26].mxu0 }
 0x9e3   : > { %v1628_v59 = vpop.f32.mrb[36].mxu1  ;;  %v3852_v60 = vpop.f32.mrb[27].mxu0  ;;  %v1692_v61 = vsel %vm1036_vm2, %v1686_v56, -inf }
 0x9e4   : > { %v1687_v62 = vmul.f32 0.35355338, %v1628_v59  ;;  %v3857_v63 = vpop.f32.mrb[37].mxu1  ;;  %1693 = vmax.xlane.f32.xlu1 %v1692_v61 }
 0x9e5   : > { %v1631_v0 = vpop.f32.mrb[38].mxu1 }
 0x9e6   : > { %v3858_v3 = vpop.f32.mrb[39].mxu1  ;;  %v1695_v4 = vsel %vm1036_vm2, %v1687_v62, -inf }
 0x9e7   : > { %1696 = vmax.xlane.f32.xlu0 %v1695_v4 }
 0x9e8   : > { %v1679_v7 = vpop.f32.mrb[28].mxu0 }
 0x9e9   : > { %v1688_v9 = vmul.f32 0.35355338, %v1679_v7  ;;  %v3863_v12 = vpop.f32.mrb[29].mxu0 }
 0x9ea   : > { %v1682_v14 = vpop.f32.mrb[30].mxu0 }
 0x9eb   : > { %v3864_v17 = vpop.f32.mrb[31].mxu0  ;;  %v1698_v19 = vsel %vm1036_vm2, %v1688_v9, -inf }
 0x9ec   : > { %1699 = vmax.xlane.f32.xlu0 %v1698_v19 }
 0xa6c   : > { %v1691_v23 = vpop.xlane.xlu0 %1690 }
 0xa6d   : > { %v1701_v24 = vsub.f32 %v1685_v50, %v1691_v23 }
 0xa6f   : > { %v1705_v25 = vmul.f32 1.442695, %v1701_v24 }
 0xa71   : > { %4187 = vpow2.f32 %v1705_v25  ;;  %v1694_v27 = vpop.xlane.xlu1 %1693 }
 0xa72   : > { %v1702_v29 = vsub.f32 %v1686_v56, %v1694_v27 }
 0xa74   : > { %v1707_v10 = vmul.f32 1.442695, %v1702_v29  ;;  %v1697_v31 = vpop.xlane.xlu0 %1696 }
 0xa75   : > { %v1703_v32 = vsub.f32 %v1687_v62, %v1697_v31 }
 0xa76   : > { %4189 = vpow2.f32 %v1707_v10 }
 0xa77   : > { %v1709_v35 = vmul.f32 1.442695, %v1703_v32 }
 0xa79   : > { %4191 = vpow2.f32 %v1709_v35  ;;  %v1700_v47 = vpop.xlane.xlu0 %1699 }
 0xa7a   : > { %v1704_v48 = vsub.f32 %v1688_v9, %v1700_v47 }
 0xa7b   : > { %v4188_v37 = vpop.eup %4187 }
 0xa7c   : > { %v1713_v39 = vsel %vm1036_vm2, %v4188_v37, 0.0  ;;  %v1711_v49 = vmul.f32 1.442695, %v1704_v48 }
 0xa7d   : > { %1714 = vadd.xlane.f32.xlu0 %v1713_v39 }
 0xa7e   : > { %4193 = vpow2.f32 %v1711_v49 }
 0xa80   : > { %v4190_v41 = vpop.eup %4189 }
 0xa81   : > { %v1716_v43 = vsel %vm1036_vm2, %v4190_v41, 0.0 }
 0xa82   : > { %1717 = vadd.xlane.f32.xlu1 %v1716_v43  ;;  %v3560_v43 = vld [vmem:[%s5203_s4 + $0x24] sm:$0xf] }
 0xa83   : > { %v4192_v44 = vpop.eup %4191 }
 0xa84   : > { %v1719_v15 = vsel %vm1036_vm2, %v4192_v44, 0.0 }
 0xa85   : > { %1720 = vadd.xlane.f32.xlu0 %v1719_v15  ;;  %v3559_v15 = vld [vmem:[%s5203_s4 + $0x20] sm:$0xf] }
 0xa88   : > { %v4194_v50 = vpop.eup %4193 }
 0xa89   : > { %v1722_v51 = vsel %vm1036_vm2, %v4194_v50, 0.0 }
 0xa93   : > { %1785 = vrot.lane.b32.xlu1 %v4840_v42, %s4394_s19 }
 0xa97   : > { %1833 = vrot.lane.b32.xlu1 %v4821_v26, %s4394_s19 }
 0xa9b   : > { %1737 = vrot.lane.b32.xlu0 %v4816_v22, %s4394_s19 }
 0xa9f   : > { %2049 = vrot.lane.b32.xlu0 %v4753_v16, %s4395_s10 }
 0xaa3   : > { %2099 = vrot.lane.b32.xlu0 %v4761_v20, %s4395_s10 }
 0xaa7   : > { %2149 = vrot.lane.b32.xlu0 %v4764_v21, %s4395_s10 }
 0xaab   : > { %2147 = vrot.lane.b32.xlu0 %v4792_v36, %s4396_s29 }
 0xabb   : > { %1723 = vadd.xlane.f32.xlu1 %v1722_v51 }
 0xacc   : > { %1881 = vrot.lane.b32.xlu1 %v4825_v11, %s4394_s19  ;;  %s3400_s19 = sshll.u32 %s299_s15, 4  ;;  %s5153_s19 = int_to_ptr.vmem [resolvable:$true] %s3400_s19 }
 0xacd   : > { %s4309_s17 = scalar_lea.vmem %s5153_s19, 512  ;;  %p4316_p13 = scmp.lt.s32.totalorder %s5153_s19, %s4314_s7 }
 0xace   : > { %p4310_p6 = scmp.ne.s32.totalorder %s5153_s19, %s4309_s17  ;;  %p4317_p3 = scmp.lt.s32.totalorder %s4315_s30, %s4309_s17 }
 0xad0   : > { %2047 = vrot.lane.b32.xlu1 %v4774_v28, %s4396_s29  ;;  %p4311_p8 = pnand %p4310_p6, %p4530_p12  ;;  %p4318_p7 = por %p4317_p3, %p4316_p13 }
 0xad2   : > { %p4312_p10 = pneg %p4311_p8 }
 0xad4   : > { %2097 = vrot.lane.b32.xlu1 %v4784_v34, %s4396_s29  ;;  %p4319_p9 = pnand %p4318_p7, %p4312_p10 }
 0xad8   : > { %2199 = vrot.lane.b32.xlu1 %v4756_v18, %s4395_s10 }
 0xadc   : > { %2197 = vrot.lane.b32.xlu1 %v4800_v38, %s4396_s29 }
 0xb0a   : > { %v1715_v52 = vpop.xlane.xlu0 %1714 }
 0xb0b   : > { %4195 = vrcp.f32 %v1715_v52 }
 0xb0f   : > { %v1718_v53 = vpop.xlane.xlu1 %1717 }
 0xb10   : > { %4197 = vrcp.f32 %v1718_v53 }
 0xb12   : > { %v1721_v54 = vpop.xlane.xlu0 %1720 }
 0xb13   : > { %4199 = vrcp.f32 %v1721_v54  ;;  %v1786_v55 = vpop.permute.xlu1 %1785 }
 0xb14   : > { %v1791_v56 = vsel %vm1288_vm3, %v1786_v55, 0 }
 0xb15   : > { %v4196_v57 = vpop.eup %4195  ;;  %3872 = vmatpush3.bf16.msra.mxu0 %v1791_v56 }
 0xb16   : > { %v1729_v58 = vmul.f32 %v4196_v57, %v4188_v37  ;;  %v1738_v59 = vpop.permute.xlu0 %1737  ;;  %3883 = vmatprep.subr.bf16.mxu0 %v4388_v8 }
 0xb17   : > { %v1743_v60 = vsel %vm1288_vm3, %v1738_v59, 0  ;;  %v1834_v61 = vpop.permute.xlu1 %1833 }
 0xb18   : > { %3866 = vmatpush3.bf16.msra.mxu1 %v1743_v60  ;;  %v1733_v62 = vpack.c.bf16 %v1729_v58, %v1729_v58  ;;  %v1839_v3 = vsel %vm1288_vm3, %v1834_v61, 0 }
 0xb19   : > { %3877 = vmatprep.subr.bf16.mxu1 %v4388_v8 }
 0xb1a   : > { %v4198_v63 = vpop.eup %4197  ;;  %v2050_v25 = vpop.permute.xlu0 %2049 }
 0xb1b   : > { %v1730_v0 = vmul.f32 %v4198_v63, %v4190_v41  ;;  %3868 = vmatmul.mubr.msk.bf16.vlgmr.msra.gmra.mrb[40].mxu1 %vm1036_vm2, %v1733_v62  ;;  %v2055_v29 = vsel %vm1036_vm2, %v2050_v25, 0  ;;  %v1996_v63 = vsel %vm1288_vm3, %v3559_v15, 0 }
 0xb1c   : > { %3878 = vmatpush3.bf16.msra.mxu1 %v1839_v3  ;;  %3879 = vmatprep.mubr.msk.bf16.mxu1 %vm4389_vm1, %v4388_v8 }
 0xb1d   : > { %v4200_v4 = vpop.eup %4199  ;;  %v1734_v7 = vpack.c.bf16 %v1730_v0, %v1730_v0  ;;  %4037 = vmatprep.subr.msk.bf16.mxu1 %vm1288_vm3, %v3560_v43 }
 0xb1e   : > { %v1731_v9 = vmul.f32 %v4200_v4, %v4192_v44  ;;  %v2100_v31 = vpop.permute.xlu0 %2099  ;;  %v1938_v44 = vsel %vm1288_vm3, %v3560_v43, 0 }
 0xb1f   : > { %3874 = vmatmul.mubr.msk.bf16.vlgmr.msra.gmra.mrb[32].mxu0 %vm1036_vm2, %v1734_v7  ;;  %v2105_v35 = vsel %vm1036_vm2, %v2100_v31, 0 }
 0xb20   : > { %v1735_v12 = vpack.c.bf16 %v1731_v9, %v1731_v9  ;;  %3885 = vmatprep.mubr.msk.bf16.mxu0 %vm4389_vm1, %v4388_v8 }
 0xb23   : > { %3880 = vmatmul.mubr.msk.bf16.vlgmr.msra.gmra.mrb[44].mxu1 %vm1036_vm2, %v1735_v12 }
 0xb24   : > { %3890 = vmatpush3.bf16.msra.mxu1 %v1938_v44 }
 0xb25   : > { %4038 = vmatprep.subr.msk.bf16.mxu1 %vm1288_vm3, %v3559_v15 }
 0xb48   : > { %v1724_v14 = vpop.xlane.xlu1 %1723 }
 0xb49   : > { %4201 = vrcp.f32 %v1724_v14 }
 0xb4c   : > { %v1882_v17 = vpop.permute.xlu1 %1881 }
 0xb4d   : > { %v1887_v19 = vsel %vm1288_vm3, %v1882_v17, 0 }
 0xb4e   : > { %3884 = vmatpush3.bf16.msra.mxu0 %v1887_v19  ;;  %v2150_v19 = vpop.permute.xlu0 %2149 }
 0xb4f   : > { %3901 = vmatprep.subr.bf16.mxu0 %v4388_v8 }
 0xb50   : > { %v2048_v10 = vpop.permute.xlu1 %2047 }
 0xb53   : > { %v4202_v23 = vpop.eup %4201 }
 0xb54   : > { %v1732_v24 = vmul.f32 %v4202_v23, %v4194_v50  ;;  %v2098_v32 = vpop.permute.xlu1 %2097  ;;  %v2155_v23 = vsel %vm1036_vm2, %v2150_v19, 0 }
 0xb56   : > { %v1736_v27 = vpack.c.bf16 %v1732_v24, %v1732_v24 }
 0xb58   : > { %3886 = vmatmul.mubr.msk.bf16.vlgmr.msra.gmra.mrb[36].mxu0 %vm1036_vm2, %v1736_v27  ;;  %v2200_v37 = vpop.permute.xlu1 %2199 }
 0xb59   : > { %3902 = vmatpush3.bf16.xpose.msra.mxu0 %v2055_v29  ;;  %3903 = vmatprep.mubr.msk.bf16.mxu0 %vm4389_vm1, %v4388_v8  ;;  %v2205_v39 = vsel %vm1036_vm2, %v2200_v37, 0  ;;  %v2148_v29 = vpop.permute.xlu0 %2147 }
 0xb5a   : > { %3907 = vmatprep.subr.bf16.mxu0 %v4388_v8 }
 0xb5c   : > { %v2198_v41 = vpop.permute.xlu1 %2197 }
 0xb60   : > { %3904 = vmatmul.mubr.msk.bf16.vlgmr.msra.gmra.mrb[40].mxu0 %vm1036_vm2, %v2048_v10 }
 0xb61   : > { %3908 = vmatpush3.bf16.xpose.msra.mxu0 %v2105_v35  ;;  %3909 = vmatprep.mubr.msk.bf16.mxu0 %vm4389_vm1, %v4388_v8 }
 0xb62   : > { %3919 = vmatprep.subr.bf16.mxu0 %v4388_v8 }
 0xb68   : > { %3910 = vmatmul.mubr.msk.bf16.vlgmr.msra.gmra.mrb[44].mxu0 %vm1036_vm2, %v2098_v32 }
 0xb69   : > { %3920 = vmatpush3.bf16.xpose.msra.mxu0 %v2205_v39  ;;  %3921 = vmatprep.mubr.msk.bf16.mxu0 %vm4389_vm1, %v4388_v8 }
 0xb6a   : > { %3931 = vmatprep.subr.bf16.mxu0 %v4388_v8 }
 0xb70   : > { %3922 = vmatmul.mubr.msk.bf16.vlgmr.msra.gmra.mrb[48].mxu0 %vm1036_vm2, %v2198_v41 }
 0xb71   : > { %3933 = vmatprep.mubr.msk.bf16.mxu0 %vm4389_vm1, %v4388_v8 }
 0xbee   : > { %v1779_v47 = vpop.f32.mrb[40].mxu1 }
 0xbef   : > { %v3869_v48 = vpop.f32.mrb[41].mxu1 }
 0xbf0   : > { %v1782_v49 = vpop.f32.mrb[42].mxu1 }
 0xbf1   : > { %v3870_v50 = vpop.f32.mrb[43].mxu1 }
 0xbf2   : > { %v1827_v51 = vpop.f32.mrb[32].mxu0 }
 0xbf3   : > { %v1929_v52 = vpack.c.bf16 %v1827_v51, %v1779_v47  ;;  %v3875_v53 = vpop.f32.mrb[33].mxu0 }
 0xbf4   : > { %v1830_v54 = vpop.f32.mrb[34].mxu0 }
 0xbf5   : > { %v3876_v55 = vpop.f32.mrb[35].mxu0  ;;  %3891 = vmatprep.mubr.msk.bf16.mxu1 %vm1036_vm2, %v1929_v52 }
 0xbf6   : > { %v1875_v56 = vpop.f32.mrb[44].mxu1 }
 0xbf7   : > { %v3881_v57 = vpop.f32.mrb[45].mxu1 }
 0xbf8   : > { %v1878_v58 = vpop.f32.mrb[46].mxu1 }
 0xbf9   : > { %v3882_v59 = vpop.f32.mrb[47].mxu1 }
 0xc2b   : > { %v1923_v60 = vpop.f32.mrb[36].mxu0 }
 0xc2c   : > { %v1930_v61 = vpack.c.bf16 %v1923_v60, %v1875_v56  ;;  %v3887_v62 = vpop.f32.mrb[37].mxu0 }
 0xc2d   : > { %v1926_v0 = vpop.f32.mrb[38].mxu0 }
 0xc2e   : > { %v3888_v3 = vpop.f32.mrb[39].mxu0  ;;  %3892 = vmatmul.mubr.msk.bf16.vlgmr.msra.gmra.mrb[48].mxu1 %vm1036_vm2, %v1930_v61 }
 0xc2f   : > { %3897 = vmatprep.mubr.msk.bf16.mxu1 %vm1036_vm2, %v1479_v33  ;;  %3896 = vmatpush3.bf16.msra.mxu1 %v1996_v63 }
 0xc30   : > { %3913 = vmatprep.subr.bf16.mxu1 %v4388_v8 }
 0xc33   : > { %v2091_v4 = vpop.f32.mrb[40].mxu0 }
 0xc34   : > { %v2247_v7 = vmul.f32 0.35355338, %v2091_v4  ;;  %v3905_v9 = vpop.f32.mrb[41].mxu0 }
 0xc35   : > { %v2094_v12 = vpop.f32.mrb[42].mxu0 }
 0xc36   : > { %v3906_v14 = vpop.f32.mrb[43].mxu0  ;;  %v2251_v17 = vsel %vm1036_vm2, %v2247_v7, -inf }
 0xc37   : > { %2252 = vmax.xlane.f32.xlu0 %v2251_v17 }
 0xc3a   : > { %3898 = vmatmul.mubr.msk.bf16.vlgmr.msra.gmra.mrb[48].mxu1 %vm1036_vm2, %v1480_v46 }
 0xc3b   : > { %3914 = vmatpush3.bf16.xpose.msra.mxu1 %v2155_v23  ;;  %v2141_v30 = vpop.f32.mrb[44].mxu0  ;;  %3915 = vmatprep.mubr.msk.bf16.mxu1 %vm4389_vm1, %v4388_v8 }
 0xc3c   : > { %v2248_v13 = vmul.f32 0.35355338, %v2141_v30  ;;  %v3911_v33 = vpop.f32.mrb[45].mxu0  ;;  %3925 = vmatprep.subr.bf16.mxu1 %v4388_v8 }
 0xc3d   : > { %v2144_v24 = vpop.f32.mrb[46].mxu0 }
 0xc3e   : > { %v3912_v25 = vpop.f32.mrb[47].mxu0  ;;  %v2254_v27 = vsel %vm1036_vm2, %v2248_v13, -inf }
 0xc3f   : > { %2255 = vmax.xlane.f32.xlu1 %v2254_v27 }
 0xc42   : > { %3916 = vmatmul.mubr.msk.bf16.vlgmr.msra.gmra.mrb[52].mxu1 %vm1036_vm2, %v2148_v29 }
 0xc43   : > { %v2241_v40 = vpop.f32.mrb[48].mxu0  ;;  %3927 = vmatprep.mubr.msk.bf16.mxu1 %vm4389_vm1, %v4388_v8 }
 0xc44   : > { %v3923_v45 = vpop.f32.mrb[49].mxu0  ;;  %v2250_v50 = vmul.f32 0.35355338, %v2241_v40 }
 0xc45   : > { %v2244_v46 = vpop.f32.mrb[50].mxu0 }
 0xc46   : > { %v3924_v10 = vpop.f32.mrb[51].mxu0  ;;  %v2260_v53 = vsel %vm1036_vm2, %v2250_v50, -inf }
 0xcc4   : > { %v2253_v41 = vpop.xlane.xlu0 %2252 }
 0xcc5   : > { %v2263_v43 = vsub.f32 %v2247_v7, %v2253_v41 }
 0xcc7   : > { %v2267_v44 = vmul.f32 1.442695, %v2263_v43 }
 0xccc   : > { %v2256_v31 = vpop.xlane.xlu1 %2255 }
 0xccd   : > { %v2264_v32 = vsub.f32 %v2248_v13, %v2256_v31 }
 0xccf   : > { %v2269_v35 = vmul.f32 1.442695, %v2264_v32 }
 0xcd1   : > { %4203 = vpow2.f32 %v2269_v35 }
 0xcd2   : > { %4205 = vpow2.f32 %v2267_v44 }
 0xcdb   : > { %v4980_v37 = vpop.eup %4203 }
 0xcdc   : > { %v2278_v39 = vsel %vm1036_vm2, %v4980_v37, 0.0  ;;  %v4206_v54 = vpop.eup %4205 }
 0xcdd   : > { %2279 = vadd.xlane.f32.xlu1 %v2278_v39  ;;  %v2275_v55 = vsel %vm1036_vm2, %v4206_v54, 0.0 }
 0xd15   : > { %v2191_v15 = vpop.f32.mrb[52].mxu1 }
 0xd16   : > { %v2249_v47 = vmul.f32 0.35355338, %v2191_v15  ;;  %v3917_v48 = vpop.f32.mrb[53].mxu1 }
 0xd17   : > { %v2194_v49 = vpop.f32.mrb[54].mxu1 }
 0xd18   : > { %v3918_v51 = vpop.f32.mrb[55].mxu1  ;;  %v2257_v52 = vsel %vm1036_vm2, %v2249_v47, -inf }
 0xd19   : > { %2258 = vmax.xlane.f32.xlu0 %v2257_v52 }
 0xd1d   : > { %2261 = vmax.xlane.f32.xlu0 %v2260_v53 }
 0xd21   : > { %2276 = vadd.xlane.f32.xlu0 %v2275_v55 }
 0xda6   : > { %v2259_v56 = vpop.xlane.xlu0 %2258 }
 0xda7   : > { %v2265_v57 = vsub.f32 %v2249_v47, %v2259_v56 }
 0xda9   : > { %v2271_v58 = vmul.f32 1.442695, %v2265_v57 }
 0xdaa   : > { %v2262_v59 = vpop.xlane.xlu0 %2261 }
 0xdab   : > { %4207 = vpow2.f32 %v2271_v58  ;;  %v2266_v60 = vsub.f32 %v2250_v50, %v2262_v59 }
 0xdad   : > { %v2273_v61 = vmul.f32 1.442695, %v2266_v60 }
 0xdae   : > { %v2277_v4 = vpop.xlane.xlu0 %2276 }
 0xdaf   : > { %4209 = vpow2.f32 %v2273_v61 }
 0xdb0   : > { %4211 = vrcp.f32 %v2277_v4 }
 0xdb5   : > { %v4208_v62 = vpop.eup %4207 }
 0xdb6   : > { %v2281_v63 = vsel %vm1036_vm2, %v4208_v62, 0.0 }
 0xdb7   : > { %2282 = vadd.xlane.f32.xlu0 %v2281_v63 }
 0xdb9   : > { %v4210_v0 = vpop.eup %4209 }
 0xdba   : > { %v2284_v3 = vsel %vm1036_vm2, %v4210_v0, 0.0  ;;  %v4212_v7 = vpop.eup %4211 }
 0xdbb   : > { %2285 = vadd.xlane.f32.xlu1 %v2284_v3 }
 0xdcc   : > { %2347 = vrot.lane.b32.xlu1 %v4840_v42, %s4397_s11 }
 0xdcd   : > { %2299 = vrot.lane.b32.xlu0 %v4816_v22, %s4397_s11 }
 0xdd0   : > { %2395 = vrot.lane.b32.xlu1 %v4821_v26, %s4397_s11 }
 0xdd1   : > { %2557 = vrot.lane.b32.xlu0 %v4753_v16, %s4398_s26  ;;  %v2280_v16 = vpop.xlane.xlu1 %2279 }
 0xdd2   : > { %4213 = vrcp.f32 %v2280_v16 }
 0xdd4   : > { %2443 = vrot.lane.b32.xlu1 %v4825_v11, %s4397_s11 }
 0xdd5   : > { %2555 = vrot.lane.b32.xlu0 %v4774_v28, %s4399_s27  ;;  %v2291_v28 = vmul.f32 %v4212_v7, %v4206_v54 }
 0xdd8   : > { %2607 = vrot.lane.b32.xlu1 %v4761_v20, %s4398_s26 }
 0xdd9   : > { %2657 = vrot.lane.b32.xlu0 %v4764_v21, %s4398_s26 }
 0xddc   : > { %2605 = vrot.lane.b32.xlu1 %v4784_v34, %s4399_s27  ;;  %v4214_v12 = vpop.eup %4213 }
 0xddd   : > { %2655 = vrot.lane.b32.xlu0 %v4792_v36, %s4399_s27  ;;  %v2292_v34 = vmul.f32 %v4214_v12, %v4980_v37  ;;  %v3561_v37 = vld [vmem:[%s5203_s4 + $0x28] sm:$0xf] }
 0xdde   : > { %v2500_v39 = vsel %vm1288_vm3, %v3561_v37, 0 }
 0xddf   : > { %v2296_v19 = vpack.c.bf16 %v2292_v34, %v2292_v34 }
 0xde0   : > { %2707 = vrot.lane.b32.xlu1 %v4756_v18, %s4398_s26  ;;  %v2295_v18 = vpack.c.bf16 %v2291_v28, %v2291_v28 }
 0xde4   : > { %2705 = vrot.lane.b32.xlu1 %v4800_v38, %s4399_s27 }
 0xe44   : > { %v2283_v9 = vpop.xlane.xlu0 %2282 }
 0xe45   : > { %4215 = vrcp.f32 %v2283_v9 }
 0xe48   : > { %v2300_v20 = vpop.permute.xlu0 %2299  ;;  %v2286_v14 = vpop.xlane.xlu1 %2285 }
 0xe49   : > { %v2305_v21 = vsel %vm1288_vm3, %v2300_v20, 0  ;;  %4217 = vrcp.f32 %v2286_v14 }
 0xe4a   : > { %3926 = vmatpush3.bf16.msra.mxu1 %v2305_v21 }
 0xe4b   : > { %3937 = vmatprep.subr.bf16.mxu1 %v4388_v8 }
 0xe4c   : > { %v2348_v36 = vpop.permute.xlu1 %2347  ;;  %v2558_v45 = vpop.permute.xlu0 %2557 }
 0xe4d   : > { %v2353_v38 = vsel %vm1288_vm3, %v2348_v36, 0  ;;  %3928 = vmatmul.mubr.msk.bf16.vlgmr.msra.gmra.mrb[56].mxu1 %vm1036_vm2, %v2295_v18  ;;  %v2563_v10 = vsel %vm1036_vm2, %v2558_v45, 0 }
 0xe4e   : > { %3932 = vmatpush3.bf16.msra.mxu0 %v2353_v38  ;;  %3939 = vmatprep.mubr.msk.bf16.mxu1 %vm4389_vm1, %v4388_v8 }
 0xe4f   : > { %v4216_v17 = vpop.eup %4215  ;;  %3943 = vmatprep.subr.bf16.mxu0 %v4388_v8 }
 0xe50   : > { %v2293_v23 = vmul.f32 %v4216_v17, %v4208_v62  ;;  %v2396_v30 = vpop.permute.xlu1 %2395  ;;  %v2556_v46 = vpop.permute.xlu0 %2555 }
 0xe51   : > { %v2401_v13 = vsel %vm1288_vm3, %v2396_v30, 0  ;;  %3934 = vmatmul.mubr.msk.bf16.vlgmr.msra.gmra.mrb[52].mxu0 %vm1036_vm2, %v2296_v19 }
 0xe52   : > { %3938 = vmatpush3.bf16.msra.mxu1 %v2401_v13  ;;  %v2297_v33 = vpack.c.bf16 %v2293_v23, %v2293_v23  ;;  %3945 = vmatprep.mubr.msk.bf16.mxu0 %vm4389_vm1, %v4388_v8 }
 0xe53   : > { %v4218_v24 = vpop.eup %4217  ;;  %4039 = vmatprep.subr.msk.bf16.mxu1 %vm1288_vm3, %v3561_v37 }
 0xe54   : > { %v2294_v25 = vmul.f32 %v4218_v24, %v4210_v0  ;;  %v2444_v27 = vpop.permute.xlu1 %2443  ;;  %v2658_v31 = vpop.permute.xlu0 %2657 }
 0xe55   : > { %v2449_v29 = vsel %vm1288_vm3, %v2444_v27, 0  ;;  %3940 = vmatmul.mubr.msk.bf16.vlgmr.msra.gmra.mrb[60].mxu1 %vm1036_vm2, %v2297_v33  ;;  %v2663_v32 = vsel %vm1036_vm2, %v2658_v31, 0 }
 0xe56   : > { %3944 = vmatpush3.bf16.msra.mxu0 %v2449_v29  ;;  %v2298_v40 = vpack.c.bf16 %v2294_v25, %v2294_v25  ;;  %3950 = vmatpush3.bf16.msra.mxu1 %v2500_v39 }
 0xe57   : > { %3955 = vmatprep.subr.bf16.mxu0 %v4388_v8  ;;  %3961 = vmatprep.subr.bf16.mxu1 %v4388_v8 }
 0xe58   : > { %v2656_v35 = vpop.permute.xlu0 %2655  ;;  %v2608_v52 = vpop.permute.xlu1 %2607 }
 0xe59   : > { %3946 = vmatmul.mubr.msk.bf16.vlgmr.msra.gmra.mrb[56].mxu0 %vm1036_vm2, %v2298_v40  ;;  %v2613_v62 = vsel %vm1036_vm2, %v2608_v52, 0 }
 0xe5a   : > { %3957 = vmatprep.mubr.msk.bf16.mxu0 %vm4389_vm1, %v4388_v8 }
 0xe5c   : > { %v2606_v60 = vpop.permute.xlu1 %2605 }
 0xe5f   : > { %3956 = vmatpush3.bf16.xpose.msra.mxu0 %v2563_v10 }
 0xe60   : > { %3967 = vmatprep.subr.bf16.mxu0 %v4388_v8  ;;  %v2708_v0 = vpop.permute.xlu1 %2707 }
 0xe61   : > { %v2713_v3 = vsel %vm1036_vm2, %v2708_v0, 0 }
 0xe64   : > { %v2706_v20 = vpop.permute.xlu1 %2705 }
 0xe66   : > { %3958 = vmatmul.mubr.msk.bf16.vlgmr.msra.gmra.mrb[60].mxu0 %vm1036_vm2, %v2556_v46 }
 0xe67   : > { %3968 = vmatpush3.bf16.xpose.msra.mxu0 %v2663_v32  ;;  %3969 = vmatprep.mubr.msk.bf16.mxu0 %vm4389_vm1, %v4388_v8 }
 0xe68   : > { %3979 = vmatprep.subr.bf16.mxu0 %v4388_v8 }
 0xe6e   : > { %3970 = vmatmul.mubr.msk.bf16.vlgmr.msra.gmra.mrb[64].mxu0 %vm1036_vm2, %v2656_v35 }
 0xe6f   : > { %3981 = vmatprep.mubr.msk.bf16.mxu0 %vm4389_vm1, %v4388_v8 }
 0xf20   : > { %v2341_v41 = vpop.f32.mrb[56].mxu1 }
 0xf21   : > { %v3929_v43 = vpop.f32.mrb[57].mxu1 }
 0xf22   : > { %v2344_v44 = vpop.f32.mrb[58].mxu1 }
 0xf23   : > { %v3930_v15 = vpop.f32.mrb[59].mxu1 }
 0xf24   : > { %v2389_v47 = vpop.f32.mrb[52].mxu0 }
 0xf25   : > { %v2491_v48 = vpack.c.bf16 %v2389_v47, %v2341_v41  ;;  %v3935_v49 = vpop.f32.mrb[53].mxu0 }
 0xf26   : > { %v2392_v50 = vpop.f32.mrb[54].mxu0 }
 0xf27   : > { %v3936_v51 = vpop.f32.mrb[55].mxu0  ;;  %3951 = vmatprep.mubr.msk.bf16.mxu1 %vm1036_vm2, %v2491_v48 }
 0xf28   : > { %v2437_v53 = vpop.f32.mrb[60].mxu1 }
 0xf29   : > { %v3941_v54 = vpop.f32.mrb[61].mxu1 }
 0xf2a   : > { %v2440_v55 = vpop.f32.mrb[62].mxu1 }
 0xf2b   : > { %v3942_v56 = vpop.f32.mrb[63].mxu1 }
 0xf2c   : > { %v2485_v57 = vpop.f32.mrb[56].mxu0 }
 0xf2d   : > { %v2492_v58 = vpack.c.bf16 %v2485_v57, %v2437_v53  ;;  %v3947_v59 = vpop.f32.mrb[57].mxu0 }
 0xf2e   : > { %v2488_v61 = vpop.f32.mrb[58].mxu0 }
 0xf2f   : > { %v3948_v63 = vpop.f32.mrb[59].mxu0  ;;  %3952 = vmatmul.mubr.msk.bf16.vlgmr.msra.gmra.mrb[48].mxu1 %vm1036_vm2, %v2492_v58 }
 0xf30   : > { %3962 = vmatpush3.bf16.xpose.msra.mxu1 %v2613_v62  ;;  %3963 = vmatprep.mubr.msk.bf16.mxu1 %vm4389_vm1, %v4388_v8 }
 0xf31   : > { %3973 = vmatprep.subr.bf16.mxu1 %v4388_v8 }
 0xf37   : > { %3964 = vmatmul.mubr.msk.bf16.vlgmr.msra.gmra.mrb[64].mxu1 %vm1036_vm2, %v2606_v60 }
 0xf38   : > { %3974 = vmatpush3.bf16.xpose.msra.mxu1 %v2713_v3  ;;  %3975 = vmatprep.mubr.msk.bf16.mxu1 %vm4389_vm1, %v4388_v8 }
 0xf39   : > { %v2599_v4 = vpop.f32.mrb[60].mxu0  ;;  %3985 = vmatprep.subr.bf16.mxu1 %v4388_v8 }
 0xf3a   : > { %v2755_v16 = vmul.f32 0.35355338, %v2599_v4  ;;  %v3959_v7 = vpop.f32.mrb[61].mxu0 }
 0xf3b   : > { %v2602_v9 = vpop.f32.mrb[62].mxu0 }
 0xf3c   : > { %v3960_v28 = vpop.f32.mrb[63].mxu0  ;;  %v2759_v12 = vsel %vm1036_vm2, %v2755_v16, -inf }
 0xf3d   : > { %2760 = vmax.xlane.f32.xlu0 %v2759_v12 }
 0xf3f   : > { %3976 = vmatmul.mubr.msk.bf16.vlgmr.msra.gmra.mrb[68].mxu1 %vm1036_vm2, %v2706_v20 }
 0xf40   : > { %3987 = vmatprep.mubr.msk.bf16.mxu1 %vm4389_vm1, %v4388_v8 }
 0xf41   : > { %v2699_v14 = vpop.f32.mrb[64].mxu0 }
 0xf42   : > { %v2757_v21 = vmul.f32 0.35355338, %v2699_v14  ;;  %v3971_v34 = vpop.f32.mrb[65].mxu0 }
 0xf43   : > { %v2702_v18 = vpop.f32.mrb[66].mxu0 }
 0xf44   : > { %v3972_v36 = vpop.f32.mrb[67].mxu0  ;;  %v2765_v38 = vsel %vm1036_vm2, %v2757_v21, -inf }
 0xf45   : > { %2766 = vmax.xlane.f32.xlu0 %v2765_v38 }
 0xfca   : > { %v2761_v17 = vpop.xlane.xlu0 %2760 }
 0xfcb   : > { %v2771_v19 = vsub.f32 %v2755_v16, %v2761_v17 }
 0xfcd   : > { %v2775_v30 = vmul.f32 1.442695, %v2771_v19 }
 0xfcf   : > { %4219 = vpow2.f32 %v2775_v30 }
 0xfd2   : > { %v2767_v23 = vpop.xlane.xlu0 %2766 }
 0xfd3   : > { %v2773_v13 = vsub.f32 %v2757_v21, %v2767_v23 }
 0xfd5   : > { %v2779_v27 = vmul.f32 1.442695, %v2773_v13 }
 0xfd7   : > { %4221 = vpow2.f32 %v2779_v27 }
 0xfd9   : > { %v4220_v39 = vpop.eup %4219 }
 0xfda   : > { %v2783_v41 = vsel %vm1036_vm2, %v4220_v39, 0.0 }
 0xfe1   : > { %v4222_v43 = vpop.eup %4221 }
 0xfe2   : > { %v2789_v44 = vsel %vm1036_vm2, %v4222_v43, 0.0 }
0x100a   : > { %v2649_v33 = vpop.f32.mrb[64].mxu1 }
0x100b   : > { %v2756_v24 = vmul.f32 0.35355338, %v2649_v33  ;;  %v3965_v25 = vpop.f32.mrb[65].mxu1  ;;  %v3562_v33 = vld [vmem:[%s5203_s4 + $0x2c] sm:$0xf] }
0x100c   : > { %v2652_v29 = vpop.f32.mrb[66].mxu1 }
0x100d   : > { %v3966_v40 = vpop.f32.mrb[67].mxu1  ;;  %v2762_v45 = vsel %vm1036_vm2, %v2756_v24, -inf }
0x100e   : > { %2763 = vmax.xlane.f32.xlu1 %v2762_v45 }
0x1012   : > { %v2749_v46 = vpop.f32.mrb[68].mxu1 }
0x1013   : > { %v2758_v10 = vmul.f32 0.35355338, %v2749_v46  ;;  %v3977_v31 = vpop.f32.mrb[69].mxu1 }
0x1014   : > { %v2752_v32 = vpop.f32.mrb[70].mxu1 }
0x1015   : > { %v3978_v35 = vpop.f32.mrb[71].mxu1  ;;  %v2768_v37 = vsel %vm1036_vm2, %v2758_v10, -inf }
0x1016   : > { %2769 = vmax.xlane.f32.xlu0 %v2768_v37  ;;  %v3603_v35 = vld [vmem:[%s5204_s5 + $0xa] ss:$0 sm:$0xff] }
0x101a   : > { %2784 = vadd.xlane.f32.xlu0 %v2783_v41 }
0x101e   : > { %2790 = vadd.xlane.f32.xlu0 %v2789_v44 }
0x101f   : > { %2855 = vrot.lane.b32.xlu1 %v4840_v42, %s4400_s8 }
0x1023   : > { %2903 = vrot.lane.b32.xlu1 %v4821_v26, %s4400_s8 }
0x1034   : > { %2807 = vrot.lane.b32.xlu0 %v4816_v22, %s4400_s8 }
0x109b   : > { %v2764_v15 = vpop.xlane.xlu1 %2763 }
0x109c   : > { %v2772_v47 = vsub.f32 %v2756_v24, %v2764_v15 }
0x109e   : > { %v2777_v48 = vmul.f32 1.442695, %v2772_v47 }
0x109f   : > { %v2856_v49 = vpop.permute.xlu1 %2855 }
0x10a0   : > { %4223 = vpow2.f32 %v2777_v48  ;;  %v2861_v50 = vsel %vm1288_vm3, %v2856_v49, 0 }
0x10a1   : > { %3986 = vmatpush3.bf16.msra.mxu1 %v2861_v50 }
0x10a2   : > { %3997 = vmatprep.subr.bf16.mxu1 %v4388_v8 }
0x10a3   : > { %v2770_v51 = vpop.xlane.xlu0 %2769  ;;  %v2904_v61 = vpop.permute.xlu1 %2903 }
0x10a4   : > { %v2774_v52 = vsub.f32 %v2758_v10, %v2770_v51  ;;  %v2909_v0 = vsel %vm1288_vm3, %v2904_v61, 0 }
0x10a6   : > { %v2781_v53 = vmul.f32 1.442695, %v2774_v52 }
0x10a7   : > { %v2785_v42 = vpop.xlane.xlu0 %2784 }
0x10a8   : > { %4225 = vpow2.f32 %v2781_v53 }
0x10a9   : > { %4227 = vrcp.f32 %v2785_v42 }
0x10aa   : > { %v4224_v26 = vpop.eup %4223 }
0x10ab   : > { %v2791_v54 = vpop.xlane.xlu0 %2790  ;;  %v2786_v22 = vsel %vm1036_vm2, %v4224_v26, 0.0 }
0x10ac   : > { %2787 = vadd.xlane.f32.xlu1 %v2786_v22  ;;  %4229 = vrcp.f32 %v2791_v54 }
0x10af   : > { %v2808_v55 = vpop.permute.xlu0 %2807 }
0x10b0   : > { %v2813_v56 = vsel %vm1288_vm3, %v2808_v55, 0 }
0x10b1   : > { %3980 = vmatpush3.bf16.msra.mxu0 %v2813_v56 }
0x10b2   : > { %v4226_v57 = vpop.eup %4225  ;;  %3991 = vmatprep.subr.bf16.mxu0 %v4388_v8 }
0x10b3   : > { %v4228_v58 = vpop.eup %4227  ;;  %v2792_v59 = vsel %vm1036_vm2, %v4226_v57, 0.0 }
0x10b4   : > { %v2799_v60 = vmul.f32 %v4228_v58, %v4220_v39  ;;  %2793 = vadd.xlane.f32.xlu1 %v2792_v59 }
0x10b6   : > { %v2803_v62 = vpack.c.bf16 %v2799_v60, %v2799_v60  ;;  %v4230_v63 = vpop.eup %4229 }
0x10b7   : > { %v2801_v3 = vmul.f32 %v4230_v63, %v4222_v43 }
0x10b8   : > { %3982 = vmatmul.mubr.msk.bf16.vlgmr.msra.gmra.mrb[68].mxu0 %vm1036_vm2, %v2803_v62 }
0x10b9   : > { %3992 = vmatpush3.bf16.msra.mxu0 %v2909_v0  ;;  %3993 = vmatprep.mubr.msk.bf16.mxu0 %vm4389_vm1, %v4388_v8  ;;  %v2805_v4 = vpack.c.bf16 %v2801_v3, %v2801_v3 }
0x10c0   : > { %3994 = vmatmul.mubr.msk.bf16.vlgmr.msra.gmra.mrb[72].mxu0 %vm1036_vm2, %v2805_v4 }
0x10c5   : > { %2951 = vrot.lane.b32.xlu1 %v4825_v11, %s4400_s8  ;;  %s3632_s8 = sshll.u32 %s4460_s25, 9  ;;  %s3387_s25 = scalar_lea.sflag [#allocation4], %s4578_s16 }
0x10c6   : > { %s5151_s20 = scalar_lea.hbm %s5205_s6, %s3632_s8 }
0x1139   : > { %v2788_v16 = vpop.xlane.xlu1 %2787 }
0x113a   : > { %4231 = vrcp.f32 %v2788_v16 }
0x1141   : > { %v2794_v7 = vpop.xlane.xlu1 %2793 }
0x1142   : > { %4233 = vrcp.f32 %v2794_v7 }
0x1144   : > { %v4232_v9 = vpop.eup %4231 }
0x1145   : > { %v2800_v28 = vmul.f32 %v4232_v9, %v4224_v26  ;;  %v2952_v12 = vpop.permute.xlu1 %2951 }
0x1146   : > { %v2957_v14 = vsel %vm1288_vm3, %v2952_v12, 0  ;;  %v4152_v12 = vld [vmem:[%s5203_s4 + $0x38] sm:$0xff]  }
0x1147   : > { %v2804_v20 = vpack.c.bf16 %v2800_v28, %v2800_v28  ;;  %v4151_v28 = vld [vmem:[%s5203_s4 + $0x30] sm:$0xff]  }
0x1148   : > { %4009 = vmatprep.subr.bf16.mxu0 %v4151_v28 }
0x1149   : > { %3988 = vmatmul.mubr.msk.bf16.vlgmr.msra.gmra.mrb[72].mxu1 %vm1036_vm2, %v2804_v20  ;;  %4010 = vmatpush3.bf16.msra.mxu0 %v4151_v28 }
0x114a   : > { %3998 = vmatpush3.bf16.msra.mxu1 %v2957_v14  ;;  %3999 = vmatprep.mubr.msk.bf16.mxu1 %vm4389_vm1, %v4388_v8  ;;  %v3008_v8 = vsel %vm1288_vm3, %v3562_v33, 0 }
0x114b   : > { %4040 = vmatprep.subr.msk.bf16.mxu1 %vm1288_vm3, %v3562_v33  ;;  %4011 = vmatprep.subr.bf16.mxu0 %v4152_v12  ;;  %v3604_v33 = vld [vmem:[%s5204_s5 + $0xb] ss:$0 sm:$0xff] }
0x114c   : > { %v4234_v21 = vpop.eup %4233 }
0x114d   : > { %v2802_v34 = vmul.f32 %v4234_v21, %v4226_v57  ;;  %4012 = vmatpush3.bf16.msra.mxu0 %v4152_v12 }
0x114f   : > { %v2806_v18 = vpack.c.bf16 %v2802_v34, %v2802_v34 }
0x1151   : > { %4000 = vmatmul.mubr.msk.bf16.vlgmr.msra.gmra.mrb[76].mxu1 %vm1036_vm2, %v2806_v18 }
0x1152   : > { %4004 = vmatpush3.bf16.msra.mxu1 %v3008_v8 }
0x118b   : > { %v2849_v11 = vpop.f32.mrb[68].mxu0 }
0x118c   : > { %v3983_v36 = vpop.f32.mrb[69].mxu0 }
0x118d   : > { %v2852_v38 = vpop.f32.mrb[70].mxu0 }
0x118e   : > { %v3984_v17 = vpop.f32.mrb[71].mxu0 }
0x1193   : > { %v2945_v19 = vpop.f32.mrb[72].mxu0 }
0x1194   : > { %v3995_v23 = vpop.f32.mrb[73].mxu0 }
0x1195   : > { %v2948_v30 = vpop.f32.mrb[74].mxu0 }
0x1196   : > { %v3996_v13 = vpop.f32.mrb[75].mxu0 }
0x121c   : > { %v2897_v24 = vpop.f32.mrb[72].mxu1 }
0x121d   : > { %v2999_v25 = vpack.c.bf16 %v2897_v24, %v2849_v11  ;;  %v3989_v27 = vpop.f32.mrb[73].mxu1 }
0x121e   : > { %v2900_v29 = vpop.f32.mrb[74].mxu1 }
0x121f   : > { %v3990_v40 = vpop.f32.mrb[75].mxu1  ;;  %4005 = vmatprep.mubr.msk.bf16.mxu1 %vm1036_vm2, %v2999_v25 }
0x1220   : > { %v3605_v40 = vld [vmem:[%s5204_s5 + $0xc] ss:$0 sm:$0xff] }
0x1224   : > { %v2993_v45 = vpop.f32.mrb[76].mxu1 }
0x1225   : > { %v3000_v46 = vpack.c.bf16 %v2993_v45, %v2945_v19  ;;  %v4001_v10 = vpop.f32.mrb[77].mxu1 }
0x1226   : > { %v2996_v31 = vpop.f32.mrb[78].mxu1 }
0x1227   : > { %v4002_v32 = vpop.f32.mrb[79].mxu1  ;;  %4006 = vmatmul.mubr.msk.bf16.vlgmr.msra.gmra.mrb[48].mxu1 %vm1036_vm2, %v3000_v46 }
0x12fa   : > { %v4007_v37 = vpop.f32.mrb[48].mxu1 }
0x12fb   : > { %v3044_v39 = vpop.f32.mrb[49].mxu1  ;;  %v3070_v41 = vadd.f32 %v4007_v37, %v3603_v35 }
0x12fc   : > { %v3068_v43 = vadd.f32 %v3603_v35, %v3044_v39  ;;  %v4008_v44 = vpop.f32.mrb[50].mxu1 }
0x12fd   : > { %v3047_v15 = vpop.f32.mrb[51].mxu1  ;;  %v3071_v49 = vadd.f32 %v4008_v44, %v3603_v35  ;;  %v3074_v52 = vadd.f32 %v3070_v41, %v4730_v5 }
0x12fe   : > { %v3069_v47 = vadd.f32 %v3603_v35, %v3047_v15  ;;  %v3072_v48 = vadd.f32 %v3068_v43, %v4723_v1 }
0x12ff   : > { %v3084_v42 = vsel %vm497_vm0, %v3074_v52, 0.0  ;;  %v3075_v26 = vadd.f32 %v3071_v49, %v4732_v6  ;;  %v3610_v49 = vld [vmem:[%s5204_s5 + $0xd] ss:$0 sm:$0xff] }
0x1300   : > { %v3078_v50 = vsel %vm497_vm0, %v3072_v48, 0.0  ;;  %v3073_v51 = vadd.f32 %v3069_v47, %v4725_v2  ;;  %v4153_v47 = vld [vmem:[%s5203_s4 + $0x40] sm:$0xff]  }
0x1301   : > { %3079 = vadd.xlane.f32.xlu0 %v3078_v50  ;;  %v3087_v54 = vsel %vm497_vm0, %v3075_v26, 0.0  ;;  %4017 = vmatprep.subr.bf16.mxu0 %v4153_v47 }
0x1302   : > { %v3081_v53 = vsel %vm497_vm0, %v3073_v51, 0.0 }
0x1303   : > { %3082 = vadd.xlane.f32.xlu1 %v3081_v53 }
0x1305   : > { %3085 = vadd.xlane.f32.xlu0 %v3084_v42 }
0x1309   : > { %3088 = vadd.xlane.f32.xlu0 %v3087_v54 }
0x138e   : > { %v3080_v1 = vpop.xlane.xlu0 %3079 }
0x138f   : > { %v3090_v22 = vmul.f32 0.03125, %v3080_v1 }
0x1390   : > { %v3083_v55 = vpop.xlane.xlu1 %3082 }
0x1391   : > { %v3094_v56 = vsub.f32 %v3072_v48, %v3090_v22  ;;  %v3091_v57 = vmul.f32 0.03125, %v3083_v55  ;;  %v4154_v48 = vld [vmem:[%s5203_s4 + $0x48] sm:$0xff]  }
0x1392   : > { %v3086_v2 = vpop.xlane.xlu0 %3085 }
0x1393   : > { %v3095_v58 = vsub.f32 %v3073_v51, %v3091_v57  ;;  %v3092_v5 = vmul.f32 0.03125, %v3086_v2  ;;  %v3098_v59 = vmul.f32 %v3094_v56, %v3094_v56 }
0x1395   : > { %v3096_v60 = vsub.f32 %v3074_v52, %v3092_v5  ;;  %v3102_v61 = vsel %vm497_vm0, %v3098_v59, 0.0  ;;  %v3099_v62 = vmul.f32 %v3095_v58, %v3095_v58  ;;  %v3619_v5 = vld [vmem:[%s5204_s5 + $0xe] ss:$0 sm:$0xff] }
0x1396   : > { %3103 = vadd.xlane.f32.xlu0 %v3102_v61  ;;  %v3089_v63 = vpop.xlane.xlu0 %3088 }
0x1397   : > { %v3093_v6 = vmul.f32 0.03125, %v3089_v63  ;;  %v3105_v0 = vsel %vm497_vm0, %v3099_v62, 0.0  ;;  %v3100_v3 = vmul.f32 %v3096_v60, %v3096_v60 }
0x1398   : > { %3106 = vadd.xlane.f32.xlu1 %v3105_v0 }
0x1399   : > { %v3097_v4 = vsub.f32 %v3075_v26, %v3093_v6  ;;  %v3108_v16 = vsel %vm497_vm0, %v3100_v3, 0.0 }
0x139a   : > { %3109 = vadd.xlane.f32.xlu0 %v3108_v16 }
0x139b   : > { %v3101_v7 = vmul.f32 %v3097_v4, %v3097_v4 }
0x139d   : > { %v3111_v9 = vsel %vm497_vm0, %v3101_v7, 0.0 }
0x139e   : > { %3112 = vadd.xlane.f32.xlu1 %v3111_v9 }
0x1423   : > { %v3104_v20 = vpop.xlane.xlu0 %3103 }
0x1424   : > { %v3114_v14 = vmul.f32 0.03125, %v3104_v20 }
0x1425   : > { %v3107_v21 = vpop.xlane.xlu1 %3106 }
0x1426   : > { %v3118_v34 = vadd.f32 1e-05, %v3114_v14  ;;  %v3115_v18 = vmul.f32 0.03125, %v3107_v21 }
0x1427   : > { %v3110_v11 = vpop.xlane.xlu0 %3109 }
0x1428   : > { %4235 = vrsqrt.f32 %v3118_v34  ;;  %v3119_v36 = vadd.f32 1e-05, %v3115_v18  ;;  %v3116_v38 = vmul.f32 0.03125, %v3110_v11 }
0x142a   : > { %4237 = vrsqrt.f32 %v3119_v36  ;;  %v3120_v17 = vadd.f32 1e-05, %v3116_v38 }
0x142b   : > { %v3113_v19 = vpop.xlane.xlu1 %3112 }
0x142c   : > { %4239 = vrsqrt.f32 %v3120_v17  ;;  %v3117_v23 = vmul.f32 0.03125, %v3113_v19 }
0x142e   : > { %v3121_v30 = vadd.f32 1e-05, %v3117_v23 }
0x1430   : > { %4241 = vrsqrt.f32 %v3121_v30 }
0x1432   : > { %v4236_v13 = vpop.eup %4235 }
0x1433   : > { %v3126_v8 = vmul.f32 %v4236_v13, %v3094_v56 }
0x1434   : > { %v4238_v24 = vpop.eup %4237 }
0x1435   : > { %v3127_v25 = vmul.f32 %v4238_v24, %v3095_v58  ;;  %v3134_v27 = vmul.f32 %v3604_v33, %v3126_v8 }
0x1436   : > { %v4240_v29 = vpop.eup %4239 }
0x1437   : > { %v3128_v45 = vmul.f32 %v4240_v29, %v3096_v60  ;;  %v3135_v46 = vmul.f32 %v3604_v33, %v3127_v25  ;;  %v3142_v10 = vadd.f32 %v3605_v40, %v3134_v27 }
0x1439   : > { %v3143_v31 = vadd.f32 %v3605_v40, %v3135_v46  ;;  %v3136_v35 = vmul.f32 %v3604_v33, %v3128_v45 }
0x143a   : > { %v4242_v32 = vpop.eup %4241 }
0x143b   : > { %v3129_v37 = vmul.f32 %v4242_v32, %v3097_v4  ;;  %v3151_v39 = vpack.c.bf16 %v3143_v31, %v3142_v10  ;;  %v3144_v43 = vadd.f32 %v3605_v40, %v3136_v35 }
0x143d   : > { %v3137_v41 = vmul.f32 %v3604_v33, %v3129_v37  ;;  %4013 = vmatprep.mubr.msk.bf16.mxu0 %vm497_vm0, %v3151_v39 }
0x143f   : > { %v3145_v44 = vadd.f32 %v3605_v40, %v3137_v41 }
0x1441   : > { %v3152_v15 = vpack.c.bf16 %v3145_v44, %v3144_v43 }
0x1443   : > { %4014 = vmatmul.mubr.msk.bf16.vlgmr.msra.gmra.mrb[76].mxu0 %vm497_vm0, %v3152_v15 }
0x1444   : > { %4018 = vmatpush3.bf16.msra.mxu0 %v4153_v47 }
0x1445   : > { %4019 = vmatprep.subr.bf16.mxu0 %v4154_v48 }
0x1448   : > { %4020 = vmatpush3.bf16.msra.mxu0 %v4154_v48 }
0x1516   : > { %v4015_v50 = vpop.f32.mrb[76].mxu0 }
0x1517   : > { %v3219_v51 = vadd.f32 %v4015_v50, %v3610_v49  ;;  %v3210_v52 = vpop.f32.mrb[77].mxu0  ;;  %v3624_v50 = vld [vmem:[%s5204_s5 + $0xf] ss:$0 sm:$0xff] }
0x1518   : > { %v3211_v53 = vadd.f32 %v3610_v49, %v3210_v52  ;;  %v4016_v42 = vpop.f32.mrb[78].mxu0 }
0x1519   : > { %v3222_v26 = vadd.f32 %v4016_v42, %v3610_v49  ;;  %v3213_v54 = vpop.f32.mrb[79].mxu0  ;;  %v3227_v22 = vmax.f32 %v3219_v51, 0.0 }
0x151a   : > { %v3214_v1 = vadd.f32 %v3610_v49, %v3213_v54  ;;  %v3225_v56 = vmax.f32 %v3211_v53, 0.0  ;;  %v3625_v53 = vld [vmem:[%s5204_s5 + $0x10] ss:$0 sm:$0xff] }
0x151b   : > { %v3228_v55 = vmax.f32 %v3222_v26, 0.0 }
0x151c   : > { %v3226_v57 = vmax.f32 %v3214_v1, 0.0 }
0x151d   : > { %v3235_v2 = vpack.c.bf16 %v3228_v55, %v3227_v22 }
0x151e   : > { %v3234_v58 = vpack.c.bf16 %v3226_v57, %v3225_v56 }
0x1520   : > { %4021 = vmatprep.mubr.msk.bf16.mxu0 %vm497_vm0, %v3234_v58 }
0x1521   : > { %4022 = vmatmul.mubr.msk.bf16.vlgmr.msra.gmra.mrb[80].mxu0 %vm497_vm0, %v3235_v2 }
0x15f4   : > { %v4023_v59 = vpop.f32.mrb[80].mxu0 }
0x15f5   : > { %v3293_v60 = vpop.f32.mrb[81].mxu0  ;;  %v3302_v61 = vadd.f32 %v4023_v59, %v3619_v5 }
0x15f6   : > { %v3294_v62 = vadd.f32 %v3619_v5, %v3293_v60  ;;  %v4024_v63 = vpop.f32.mrb[82].mxu0 }
0x15f7   : > { %v3296_v6 = vpop.f32.mrb[83].mxu0  ;;  %v3305_v3 = vadd.f32 %v4024_v63, %v3619_v5  ;;  %v3310_v16 = vadd.f32 %v3302_v61, %v3144_v43 }
0x15f8   : > { %v3308_v0 = vadd.f32 %v3294_v62, %v3142_v10  ;;  %v3297_v4 = vadd.f32 %v3619_v5, %v3296_v6 }
0x15f9   : > { %v3311_v28 = vadd.f32 %v3305_v3, %v3145_v44  ;;  %v3320_v20 = vsel %vm497_vm0, %v3310_v16, 0.0 }
0x15fa   : > { %v3309_v7 = vadd.f32 %v3297_v4, %v3143_v31  ;;  %v3314_v9 = vsel %vm497_vm0, %v3308_v0, 0.0 }
0x15fb   : > { %3315 = vadd.xlane.f32.xlu0 %v3314_v9  ;;  %v3323_v14 = vsel %vm497_vm0, %v3311_v28, 0.0 }
0x15fc   : > { %v3317_v12 = vsel %vm497_vm0, %v3309_v7, 0.0 }
0x15fd   : > { %3318 = vadd.xlane.f32.xlu1 %v3317_v12 }
0x15ff   : > { %3321 = vadd.xlane.f32.xlu0 %v3320_v20 }
0x1601   : > { %3324 = vadd.xlane.f32.xlu1 %v3323_v14 }
0x1688   : > { %v3316_v21 = vpop.xlane.xlu0 %3315 }
0x1689   : > { %v3326_v34 = vmul.f32 0.03125, %v3316_v21 }
0x168a   : > { %v3319_v18 = vpop.xlane.xlu1 %3318 }
0x168b   : > { %v3330_v11 = vsub.f32 %v3308_v0, %v3326_v34  ;;  %v3327_v36 = vmul.f32 0.03125, %v3319_v18 }
0x168c   : > { %v3322_v38 = vpop.xlane.xlu0 %3321 }
0x168d   : > { %v3331_v17 = vsub.f32 %v3309_v7, %v3327_v36  ;;  %v3328_v19 = vmul.f32 0.03125, %v3322_v38  ;;  %v3334_v23 = vmul.f32 %v3330_v11, %v3330_v11 }
0x168e   : > { %v3325_v30 = vpop.xlane.xlu1 %3324 }
0x168f   : > { %v3332_v13 = vsub.f32 %v3310_v16, %v3328_v19  ;;  %v3329_v33 = vmul.f32 0.03125, %v3325_v30  ;;  %v3338_v8 = vsel %vm497_vm0, %v3334_v23, 0.0  ;;  %v3335_v24 = vmul.f32 %v3331_v17, %v3331_v17 }
0x1690   : > { %3339 = vadd.xlane.f32.xlu0 %v3338_v8 }
0x1691   : > { %v3333_v25 = vsub.f32 %v3311_v28, %v3329_v33  ;;  %v3341_v27 = vsel %vm497_vm0, %v3335_v24, 0.0  ;;  %v3336_v29 = vmul.f32 %v3332_v13, %v3332_v13 }
0x1692   : > { %3342 = vadd.xlane.f32.xlu1 %v3341_v27 }
0x1693   : > { %v3344_v40 = vsel %vm497_vm0, %v3336_v29, 0.0  ;;  %v3337_v45 = vmul.f32 %v3333_v25, %v3333_v25 }
0x1694   : > { %3345 = vadd.xlane.f32.xlu0 %v3344_v40 }
0x1695   : > { %v3347_v46 = vsel %vm497_vm0, %v3337_v45, 0.0 }
0x1696   : > { %3348 = vadd.xlane.f32.xlu1 %v3347_v46 }
0x171d   : > { %v3340_v10 = vpop.xlane.xlu0 %3339 }
0x171e   : > { %v3350_v31 = vmul.f32 0.03125, %v3340_v10 }
0x171f   : > { %v3343_v32 = vpop.xlane.xlu1 %3342 }
0x1720   : > { %v3354_v35 = vadd.f32 1e-05, %v3350_v31  ;;  %v3351_v37 = vmul.f32 0.03125, %v3343_v32 }
0x1721   : > { %v3346_v39 = vpop.xlane.xlu0 %3345 }
0x1722   : > { %4243 = vrsqrt.f32 %v3354_v35  ;;  %v3355_v41 = vadd.f32 1e-05, %v3351_v37  ;;  %v3352_v43 = vmul.f32 0.03125, %v3346_v39 }
0x1723   : > { %v3349_v44 = vpop.xlane.xlu1 %3348 }
0x1724   : > { %4245 = vrsqrt.f32 %v3355_v41  ;;  %v3356_v15 = vadd.f32 1e-05, %v3352_v43  ;;  %v3353_v47 = vmul.f32 0.03125, %v3349_v44 }
0x1726   : > { %4247 = vrsqrt.f32 %v3356_v15  ;;  %v3357_v48 = vadd.f32 1e-05, %v3353_v47 }
0x1728   : > { %4249 = vrsqrt.f32 %v3357_v48 }
0x172c   : > { %v4244_v49 = vpop.eup %4243 }
0x172d   : > { %v3362_v51 = vmul.f32 %v4244_v49, %v3330_v11 }
0x172e   : > { %v4246_v52 = vpop.eup %4245 }
0x172f   : > { %v3370_v42 = vmul.f32 %v3624_v50, %v3362_v51  ;;  %v3363_v26 = vmul.f32 %v4246_v52, %v3331_v17 }
0x1730   : > { %v4248_v54 = vpop.eup %4247 }
0x1731   : > { %v3378_v1 = vadd.f32 %v3625_v53, %v3370_v42  ;;  %v3371_v22 = vmul.f32 %v3624_v50, %v3363_v26  ;;  %v3364_v55 = vmul.f32 %v4248_v54, %v3332_v13 }
0x1732   : > { %v4250_v56 = vpop.eup %4249 }
0x1733   : > { %v3379_v57 = vadd.f32 %v3625_v53, %v3371_v22  ;;  %v3372_v2 = vmul.f32 %v3624_v50, %v3364_v55  ;;  %3382 = vst.msk [vmem:[%s299_s15] sm:$0xff] %vm497_vm0, %v3378_v1  ;;  %v3365_v58 = vmul.f32 %v4250_v56, %v3333_v25 }
0x1735   : > { %v3380_v5 = vadd.f32 %v3625_v53, %v3372_v2  ;;  %3383 = vst.msk [vmem:[%s299_s15 + $0x8] sm:$0xff] %vm497_vm0, %v3379_v57  ;;  %v3373_v59 = vmul.f32 %v3624_v50, %v3365_v58 }
0x1737   : > { %3384 = vst.msk [vmem:[%s299_s15 + $0x10] sm:$0xff] %vm497_vm0, %v3380_v5  ;;  %v3381_v60 = vadd.f32 %v3625_v53, %v3373_v59 }
0x1739   : > { %3385 = vst.msk [vmem:[%s299_s15 + $0x18] sm:$0xff] %vm497_vm0, %v3381_v60 }
0x173a   : > { %4322 = shalt.err (!%p4319_p9)
}
0x173b   : > { %s4323_s11 = scalar_lea.hbm %s5151_s20, 512  ;;  %s4327_s12 = scalar_lea.hbm %s5205_s6, 1024 }
0x173c   : > { %p4324_p2 = scmp.ne.s32.totalorder %s5151_s20, %s4323_s11  ;;  %p4328_p11 = scmp.lt.u32.totalorder %s5151_s20, %s5205_s6 }
0x173d   : > { %p4329_p1 = scmp.lt.u32.totalorder %s4327_s12, %s4323_s11  ;;  %p4331_p6 = scmp.lt.u32.totalorder %s4323_s11, %s5151_s20 }
0x173e   : > { %p4325_p0 = pnand %p4324_p2, %p4530_p12 }
0x173f   : > { %p4330_p4 = por %p4329_p1, %p4328_p11 }
0x1740   : > { %p4326_p5 = pneg %p4325_p0 }
0x1741   : > { %p4332_p8 = por %p4331_p6, %p4330_p4 }
0x1743   : > { %p4333_p10 = pnand %p4332_p8, %p4326_p5 }
0x1745   : > { %4336 = shalt.err (!%p4333_p10)
}
0x1746   : > { %s4402_s10 = smov 128   ;;  %s4403_s29 = smov 8  }
0x1747   : > { %4048 = dma.vmem_to_hbm [thread:$0]  (%p4530_p12), %s5153_s19, 512, %s5151_s20, %s3387_s25, %s4402_s10, %s4402_s10, %s4403_s29  }
0x1748 PF: > { %s3415_s17 = sand.u32 1, %s4367_s21   ;;  %p5220_p13 = scmp.ne.s32.totalorder %s5210_s28, 0 }
0x1749   : > { %p5221_p3 = scmp.ge.s32.totalorder %s4379_s24, 2  ;;  %s3416_s18 = scalar_lea.sflag [#allocation4], %s3415_s17 }
0x174b   : > { %p4059_p7 = pnand %p5221_p3, %p5220_p13 }
0x174d   : > { %4362 = dma.done.wait (!%p4059_p7), %s3416_s18, 512  }
0x174e   : > { %4364 = vsyncadd (!%p4059_p7), %s3416_s18, 4294966784  ;;  %p20_p9 = scmp.ge.s32.totalorder %s4495_s9, 4   ;;  %s5222_s21 = smov %s4371_s22 }
0x174f   : > { %s5223_s22 = smov %s4375_s23  ;;  %s5224_s23 = smov %s4526_s13 }
0x1750   : > { %s5225_s24 = smov %s4495_s9  ;;  %22 = sbr.rel (!%p20_p9) target bundleno = 6 (0x6), region = 100 }
0x1757   :  { %3421 = vsyncpa [#allocation3], 1 }
0x1758   :  { %3423 = vsyncpa [#allocation3 + $0x1], 1 }
0x1759   :  { %3424 = vsyncpa [#allocation6], 1 }
0x175a   :  { %3425 = vsyncpa [#allocation4], 1 }
0x175b   :  { %3427 = vsyncpa [#allocation4 + $0x1], 1 }

</bundles_post_ra>
